<compile_context>
chip_gen: v7x
topology: tpu7x:2x2x1
jax: 0.10.0
libtpu: 0.0.40
codegen_flags: <defaults>
</compile_context>

<pallas_src>
import jax
import jax.numpy as jnp
from jax.experimental import pallas as pl
from jax.experimental.pallas import tpu as pltpu

BN_EPS = 1e-5  # nn.BatchNorm2d default eps

_CPARAMS = pltpu.CompilerParams(
    dimension_semantics=("parallel",),
    vmem_limit_bytes=32 * 1024 * 1024,
)


# --------------------------------------------------------------------------
# Pallas kernels
# --------------------------------------------------------------------------
def _pass1_kernel(g_ref, x_ref, wg_ref, wx_ref, yg_ref, yx_ref, stats_ref):
    """bf16 MXU matmuls for W_g / W_x + per-tile BN partial statistics."""
    yg = jnp.dot(g_ref[...], wg_ref[...], preferred_element_type=jnp.float32)
    yx = jnp.dot(x_ref[...], wx_ref[...], preferred_element_type=jnp.float32)
    yg_ref[...] = yg
    yx_ref[...] = yx
    # Per-tile partial sums and sums-of-squares (reduced over tiles on host).
    s = jnp.concatenate(
        [
            jnp.sum(yg, axis=0, keepdims=True),
            jnp.sum(yg * yg, axis=0, keepdims=True),
            jnp.sum(yx, axis=0, keepdims=True),
            jnp.sum(yx * yx, axis=0, keepdims=True),
        ],
        axis=0,
    )  # (4, F_int)
    stats_ref[...] = s[None]


def _pass2_kernel(yg_ref, yx_ref, sg_ref, sx_ref, wpsi_ref, yp_ref):
    """Folded BN affine for g1/x1, ReLU(g1+x1), psi 1x1 conv (Cout=1)."""
    g1 = yg_ref[...] * sg_ref[0:1, :] + sg_ref[1:2, :]
    x1 = yx_ref[...] * sx_ref[0:1, :] + sx_ref[1:2, :]
    s = jnp.maximum(g1 + x1, 0.0)
    # Cout == 1: VPU multiply + cross-lane reduce instead of an MXU matmul.
    yp_ref[...] = jnp.sum(s * wpsi_ref[...], axis=-1, keepdims=True)


def _pass3_kernel(x_ref, yp_ref, ps_ref, o_ref):
    """out = x * sigmoid(psi_scale * yp + psi_shift)."""
    z = yp_ref[...] * ps_ref[0] + ps_ref[1]
    psi = 1.0 / (1.0 + jnp.exp(-z))          # (tm, 1), EUP exp
    o_ref[...] = x_ref[...] * psi            # broadcast over channel lanes


# --------------------------------------------------------------------------
# pallas_call wrappers
# --------------------------------------------------------------------------
def _pick_tm(m):
    """Largest row tile that divides M and still leaves >= 2 grid steps."""
    for t in (1024, 512, 256, 128, 64, 32, 16, 8):
        if m % t == 0 and m // t >= 2:
            return t
    return m


def _pass1_call(g_bf, x_bf, wg_bf, wx_bf, tm, nt, f_int):
    m, fg = g_bf.shape
    fl = x_bf.shape[1]
    return pl.pallas_call(
        _pass1_kernel,
        out_shape=(
            jax.ShapeDtypeStruct((m, f_int), jnp.float32),
            jax.ShapeDtypeStruct((m, f_int), jnp.float32),
            jax.ShapeDtypeStruct((nt, 4, f_int), jnp.float32),
        ),
        grid=(nt,),
        in_specs=[
            pl.BlockSpec((tm, fg), lambda i: (i, 0)),
            pl.BlockSpec((tm, fl), lambda i: (i, 0)),
            pl.BlockSpec((fg, f_int), lambda i: (0, 0)),
            pl.BlockSpec((fl, f_int), lambda i: (0, 0)),
        ],
        out_specs=(
            pl.BlockSpec((tm, f_int), lambda i: (i, 0)),
            pl.BlockSpec((tm, f_int), lambda i: (i, 0)),
            pl.BlockSpec((1, 4, f_int), lambda i: (i, 0, 0)),
        ),
        compiler_params=_CPARAMS,
    )(g_bf, x_bf, wg_bf, wx_bf)


def _pass2_call(yg, yx, sg, sx, wpsi_row, tm, nt):
    m, f_int = yg.shape
    return pl.pallas_call(
        _pass2_kernel,
        out_shape=jax.ShapeDtypeStruct((m, 1), jnp.float32),
        grid=(nt,),
        in_specs=[
            pl.BlockSpec((tm, f_int), lambda i: (i, 0)),
            pl.BlockSpec((tm, f_int), lambda i: (i, 0)),
            pl.BlockSpec((2, f_int), lambda i: (0, 0)),
            pl.BlockSpec((2, f_int), lambda i: (0, 0)),
            pl.BlockSpec((1, f_int), lambda i: (0, 0)),
        ],
        out_specs=pl.BlockSpec((tm, 1), lambda i: (i, 0)),
        compiler_params=_CPARAMS,
    )(yg, yx, sg, sx, wpsi_row)


def _pass3_call(x2, yp, ps, tm, nt):
    m, fl = x2.shape
    return pl.pallas_call(
        _pass3_kernel,
        out_shape=jax.ShapeDtypeStruct((m, fl), jnp.float32),
        grid=(nt,),
        in_specs=[
            pl.BlockSpec((tm, fl), lambda i: (i, 0)),
            pl.BlockSpec((tm, 1), lambda i: (i, 0)),
            pl.BlockSpec(memory_space=pltpu.MemorySpace.SMEM),
        ],
        out_specs=pl.BlockSpec((tm, fl), lambda i: (i, 0)),
        compiler_params=_CPARAMS,
    )(x2, yp, ps)


# --------------------------------------------------------------------------
# Parameters (synthetic, deterministic) — matmul layout (Cin, Cout)
# --------------------------------------------------------------------------
def init_attention_block(key, f_g, f_l, f_int):
    ks = jax.random.split(key, 9)

    def conv(kw, kb, cin, cout):
        bound = 1.0 / (cin ** 0.5)           # 1x1 conv: fan_in = cin
        w = jax.random.uniform(kw, (cin, cout), jnp.float32, -bound, bound)
        b = jax.random.uniform(kb, (cout,), jnp.float32, -bound, bound)
        return w, b

    def bn(k, c):
        kg, kb = jax.random.split(k)
        gamma = 1.0 + 0.1 * jax.random.normal(kg, (c,), jnp.float32)
        beta = 0.1 * jax.random.normal(kb, (c,), jnp.float32)
        return gamma, beta

    wg, bg = conv(ks[0], ks[1], f_g, f_int)
    wx, bx = conv(ks[2], ks[3], f_l, f_int)
    wpsi, bpsi = conv(ks[4], ks[5], f_int, 1)
    return dict(
        wg=wg, bg=bg, wx=wx, bx=bx, wpsi=wpsi, bpsi=bpsi,
        bn_g=bn(ks[6], f_int), bn_x=bn(ks[7], f_int), bn_p=bn(ks[8], 1),
    )


# --------------------------------------------------------------------------
# Forward pass (Pallas) and pure-JAX reference
# --------------------------------------------------------------------------
def attention_block_forward(params, g_nchw, x_nchw):
    n, cg, h, w = g_nchw.shape
    cl = x_nchw.shape[1]
    f_int = params["wg"].shape[1]
    m = n * h * w

    g2 = jnp.transpose(g_nchw, (0, 2, 3, 1)).reshape(m, cg).astype(jnp.float32)
    x2 = jnp.transpose(x_nchw, (0, 2, 3, 1)).reshape(m, cl).astype(jnp.float32)

    # bf16 operands for the MXU (accumulation stays f32 inside the kernels).
    g_bf = g2.astype(jnp.bfloat16)
    x_bf = x2.astype(jnp.bfloat16)
    wg_bf = params["wg"].astype(jnp.bfloat16)
    wx_bf = params["wx"].astype(jnp.bfloat16)

    tm = _pick_tm(m)
    nt = m // tm

    # --- pass 1: conv matmuls + per-tile BN partial sums -------------------
    yg, yx, pstats = _pass1_call(g_bf, x_bf, wg_bf, wx_bf, tm, nt, f_int)

    # Tiny per-channel finalize of training-mode BN -> folded affine.
    # (conv bias is cancelled exactly by the mean subtraction, so it is
    #  never added in the kernel.)
    s = jnp.sum(pstats, axis=0)                      # (4, F_int)
    inv_m = 1.0 / float(m)
    mu_g = s[0] * inv_m
    var_g = jnp.maximum(s[1] * inv_m - mu_g * mu_g, 0.0)
    mu_x = s[2] * inv_m
    var_x = jnp.maximum(s[3] * inv_m - mu_x * mu_x, 0.0)
    gam_g, bet_g = params["bn_g"]
    gam_x, bet_x = params["bn_x"]
    scale_g = gam_g * jax.lax.rsqrt(var_g + BN_EPS)
    shift_g = bet_g - mu_g * scale_g
    scale_x = gam_x * jax.lax.rsqrt(var_x + BN_EPS)
    shift_x = bet_x - mu_x * scale_x
    sg = jnp.stack([scale_g, shift_g]).astype(jnp.float32)   # (2, F_int)
    sx = jnp.stack([scale_x, shift_x]).astype(jnp.float32)   # (2, F_int)

    wpsi_row = params["wpsi"].reshape(1, f_int).astype(jnp.float32)

    # --- pass 2: BN affine + ReLU + psi projection --------------------------
    yp = _pass2_call(yg, yx, sg, sx, wpsi_row, tm, nt)       # (M, 1)

    # psi BatchNorm (single channel) stats -> folded scalar affine.
    mu_p = jnp.mean(yp)
    var_p = jnp.maximum(jnp.mean(yp * yp) - mu_p * mu_p, 0.0)
    gam_p, bet_p = params["bn_p"]
    psi_scale = gam_p[0] * jax.lax.rsqrt(var_p + BN_EPS)
    psi_shift = bet_p[0] - mu_p * psi_scale
    ps = jnp.stack([psi_scale, psi_shift]).astype(jnp.float32)   # (2,)

    # --- pass 3: sigmoid gate applied to x ----------------------------------
    out2 = _pass3_call(x2, yp, ps, tm, nt)                   # (M, F_l)
    return jnp.transpose(out2.reshape(n, h, w, cl), (0, 3, 1, 2))


def attention_block_reference(params, g_nchw, x_nchw):
    """Pure-JAX reference (keeps the conv biases; train-mode BatchNorm)."""
    n, cg, h, w = g_nchw.shape
    cl = x_nchw.shape[1]
    m = n * h * w
    g2 = jnp.transpose(g_nchw, (0, 2, 3, 1)).reshape(m, cg).astype(jnp.float32)
    x2 = jnp.transpose(x_nchw, (0, 2, 3, 1)).reshape(m, cl).astype(jnp.float32)

    def bn(y, gamma, beta):
        mu = jnp.mean(y, axis=0, keepdims=True)
        var = jnp.var(y, axis=0, keepdims=True)
        return (y - mu) * jax.lax.rsqrt(var + BN_EPS) * gamma + beta

    yg = jnp.dot(g2.astype(jnp.bfloat16), params["wg"].astype(jnp.bfloat16),
                 preferred_element_type=jnp.float32) + params["bg"]
    yx = jnp.dot(x2.astype(jnp.bfloat16), params["wx"].astype(jnp.bfloat16),
                 preferred_element_type=jnp.float32) + params["bx"]
    g1 = bn(yg, params["bn_g"][0], params["bn_g"][1])
    x1 = bn(yx, params["bn_x"][0], params["bn_x"][1])
    s = jnp.maximum(g1 + x1, 0.0)
    yp = jnp.dot(s, params["wpsi"]) + params["bpsi"]          # (M, 1)
    psi = jax.nn.sigmoid(bn(yp, params["bn_p"][0], params["bn_p"][1]))
    out2 = x2 * psi
    return jnp.transpose(out2.reshape(n, h, w, cl), (0, 3, 1, 2))


# --------------------------------------------------------------------------
if __name__ == "__main__":
    key = jax.random.PRNGKey(0)
    kp, kg, kx = jax.random.split(key, 3)

    N, H, W = 2, 16, 16
    F_g, F_l, F_int = 32, 32, 16

    params = init_attention_block(kp, F_g, F_l, F_int)
    g = jax.random.normal(kg, (N, F_g, H, W), jnp.float32)
    x = jax.random.normal(kx, (N, F_l, H, W), jnp.float32)

    fwd = jax.jit(attention_block_forward)
    y = jax.block_until_ready(fwd(params, g, x))
    y_ref = jax.block_until_ready(attention_block_reference(params, g, x))

    assert y.shape == (N, F_l, H, W)
    assert bool(jnp.all(jnp.isfinite(y)))
    assert bool(jnp.allclose(y, y_ref, atol=2e-3, rtol=2e-3))
    print("KERNEL_OK")
</pallas_src>

<mosaic_0001>
module attributes {stable_mosaic.version = 11 : i64} {
  func.func @_pass1_kernel(%arg0: i32, %arg1: memref<256x32xbf16, #tpu.memory_space<vmem>>, %arg2: memref<256x32xbf16, #tpu.memory_space<vmem>>, %arg3: memref<32x16xbf16, #tpu.memory_space<vmem>>, %arg4: memref<32x16xbf16, #tpu.memory_space<vmem>>, %arg5: memref<256x16xf32, #tpu.memory_space<vmem>>, %arg6: memref<256x16xf32, #tpu.memory_space<vmem>>, %arg7: memref<1x4x16xf32, #tpu.memory_space<vmem>>) attributes {dimension_semantics = [#tpu.dimension_semantics<parallel>], iteration_bounds = array<i64: 2>, scalar_prefetch = 0 : i64, scratch_operands = 0 : i64, tpu.core_type = #tpu.core_type<tc>, window_params = [{transform_indices = @transform_0, window_bounds = array<i64: 256, 32>}, {transform_indices = @transform_1, window_bounds = array<i64: 256, 32>}, {pipeline_mode = #tpu.pipeline_mode<synchronous>, transform_indices = @transform_2, window_bounds = array<i64: 32, 16>}, {pipeline_mode = #tpu.pipeline_mode<synchronous>, transform_indices = @transform_3, window_bounds = array<i64: 32, 16>}, {transform_indices = @transform_4, window_bounds = array<i64: 256, 16>}, {transform_indices = @transform_5, window_bounds = array<i64: 256, 16>}, {transform_indices = @transform_6, window_bounds = array<i64: 1, 4, 16>}]} {
    %c0 = arith.constant 0 : index
    %c0_0 = arith.constant 0 : index
    %0 = vector.load %arg1[%c0, %c0_0] : memref<256x32xbf16, #tpu.memory_space<vmem>>, vector<256x32xbf16>
    %c0_1 = arith.constant 0 : index
    %c0_2 = arith.constant 0 : index
    %1 = vector.load %arg3[%c0_1, %c0_2] : memref<32x16xbf16, #tpu.memory_space<vmem>>, vector<32x16xbf16>
    %cst = arith.constant dense<0.000000e+00> : vector<256x16xf32>
    %2 = tpu.matmul %0, %1, %cst {dimension_numbers = #tpu.dot_dimension_numbers<[1], [0], [0], [1], [0, 0, 1, 1], [], []>} : vector<256x32xbf16>, vector<32x16xbf16>, vector<256x16xf32> -> vector<256x16xf32>
    %c0_3 = arith.constant 0 : index
    %c0_4 = arith.constant 0 : index
    %3 = vector.load %arg2[%c0_3, %c0_4] : memref<256x32xbf16, #tpu.memory_space<vmem>>, vector<256x32xbf16>
    %c0_5 = arith.constant 0 : index
    %c0_6 = arith.constant 0 : index
    %4 = vector.load %arg4[%c0_5, %c0_6] : memref<32x16xbf16, #tpu.memory_space<vmem>>, vector<32x16xbf16>
    %cst_7 = arith.constant dense<0.000000e+00> : vector<256x16xf32>
    %5 = tpu.matmul %3, %4, %cst_7 {dimension_numbers = #tpu.dot_dimension_numbers<[1], [0], [0], [1], [0, 0, 1, 1], [], []>} : vector<256x32xbf16>, vector<32x16xbf16>, vector<256x16xf32> -> vector<256x16xf32>
    %c0_8 = arith.constant 0 : index
    %c0_9 = arith.constant 0 : index
    %6 = vector.load %arg5[%c0_8, %c0_9] : memref<256x16xf32, #tpu.memory_space<vmem>>, vector<256x16xf32>
    tpu.vector_store %arg5[%c0_8, %c0_9], %2 {strides = array<i32>} : memref<256x16xf32, #tpu.memory_space<vmem>>, vector<256x16xf32>,
    %c0_10 = arith.constant 0 : index
    %c0_11 = arith.constant 0 : index
    %7 = vector.load %arg6[%c0_10, %c0_11] : memref<256x16xf32, #tpu.memory_space<vmem>>, vector<256x16xf32>
    tpu.vector_store %arg6[%c0_10, %c0_11], %5 {strides = array<i32>} : memref<256x16xf32, #tpu.memory_space<vmem>>, vector<256x16xf32>,
    %cst_12 = arith.constant dense<0.000000e+00> : vector<16xf32>
    %8 = vector.multi_reduction <add>, %2, %cst_12 [0] : vector<256x16xf32> to vector<16xf32>
    %9 = vector.shape_cast %8 : vector<16xf32> to vector<1x16xf32>
    %10 = arith.mulf %2, %2 : vector<256x16xf32>
    %cst_13 = arith.constant dense<0.000000e+00> : vector<16xf32>
    %11 = vector.multi_reduction <add>, %10, %cst_13 [0] : vector<256x16xf32> to vector<16xf32>
    %12 = vector.shape_cast %11 : vector<16xf32> to vector<1x16xf32>
    %cst_14 = arith.constant dense<0.000000e+00> : vector<16xf32>
    %13 = vector.multi_reduction <add>, %5, %cst_14 [0] : vector<256x16xf32> to vector<16xf32>
    %14 = vector.shape_cast %13 : vector<16xf32> to vector<1x16xf32>
    %15 = arith.mulf %5, %5 : vector<256x16xf32>
    %cst_15 = arith.constant dense<0.000000e+00> : vector<16xf32>
    %16 = vector.multi_reduction <add>, %15, %cst_15 [0] : vector<256x16xf32> to vector<16xf32>
    %17 = vector.shape_cast %16 : vector<16xf32> to vector<1x16xf32>
    %18 = tpu.concatenate %9, %12, %14, %17 in 0 : vector<1x16xf32>, vector<1x16xf32>, vector<1x16xf32>, vector<1x16xf32> -> vector<4x16xf32>
    %19 = vector.shape_cast %18 : vector<4x16xf32> to vector<1x4x16xf32>
    %c0_16 = arith.constant 0 : index
    %c0_17 = arith.constant 0 : index
    %c0_18 = arith.constant 0 : index
    %20 = vector.load %arg7[%c0_16, %c0_17, %c0_18] : memref<1x4x16xf32, #tpu.memory_space<vmem>>, vector<1x4x16xf32>
    tpu.vector_store %arg7[%c0_16, %c0_17, %c0_18], %19 {strides = array<i32>} : memref<1x4x16xf32, #tpu.memory_space<vmem>>, vector<1x4x16xf32>,
    return
  }
  func.func @transform_0(%arg0: i32) -> (i32, i32) {
    %c0_i32 = arith.constant 0 : i32
    %c0_i32_0 = arith.constant 0 : i32
    return %arg0, %c0_i32 : i32, i32
  }
  func.func @transform_1(%arg0: i32) -> (i32, i32) {
    %c0_i32 = arith.constant 0 : i32
    %c0_i32_0 = arith.constant 0 : i32
    return %arg0, %c0_i32 : i32, i32
  }
  func.func @transform_2(%arg0: i32) -> (i32, i32) {
    %c0_i32 = arith.constant 0 : i32
    %c0_i32_0 = arith.constant 0 : i32
    %c0_i32_1 = arith.constant 0 : i32
    return %c0_i32, %c0_i32_0 : i32, i32
  }
  func.func @transform_3(%arg0: i32) -> (i32, i32) {
    %c0_i32 = arith.constant 0 : i32
    %c0_i32_0 = arith.constant 0 : i32
    %c0_i32_1 = arith.constant 0 : i32
    return %c0_i32, %c0_i32_0 : i32, i32
  }
  func.func @transform_4(%arg0: i32) -> (i32, i32) {
    %c0_i32 = arith.constant 0 : i32
    %c0_i32_0 = arith.constant 0 : i32
    return %arg0, %c0_i32 : i32, i32
  }
  func.func @transform_5(%arg0: i32) -> (i32, i32) {
    %c0_i32 = arith.constant 0 : i32
    %c0_i32_0 = arith.constant 0 : i32
    return %arg0, %c0_i32 : i32, i32
  }
  func.func @transform_6(%arg0: i32) -> (i32, i32, i32) {
    %c0_i32 = arith.constant 0 : i32
    %c0_i32_0 = arith.constant 0 : i32
    %c0_i32_1 = arith.constant 0 : i32
    return %arg0, %c0_i32, %c0_i32_0 : i32, i32, i32
  }
}

module attributes {stable_mosaic.version = 11 : i64} {
  func.func @_pass2_kernel(%arg0: i32, %arg1: memref<256x16xf32, #tpu.memory_space<vmem>>, %arg2: memref<256x16xf32, #tpu.memory_space<vmem>>, %arg3: memref<2x16xf32, #tpu.memory_space<vmem>>, %arg4: memref<2x16xf32, #tpu.memory_space<vmem>>, %arg5: memref<1x16xf32, #tpu.memory_space<vmem>>, %arg6: memref<256x1xf32, #tpu.memory_space<vmem>>) attributes {dimension_semantics = [#tpu.dimension_semantics<parallel>], iteration_bounds = array<i64: 2>, scalar_prefetch = 0 : i64, scratch_operands = 0 : i64, tpu.core_type = #tpu.core_type<tc>, window_params = [{transform_indices = @transform_0, window_bounds = array<i64: 256, 16>}, {transform_indices = @transform_1, window_bounds = array<i64: 256, 16>}, {pipeline_mode = #tpu.pipeline_mode<synchronous>, transform_indices = @transform_2, window_bounds = array<i64: 2, 16>}, {pipeline_mode = #tpu.pipeline_mode<synchronous>, transform_indices = @transform_3, window_bounds = array<i64: 2, 16>}, {pipeline_mode = #tpu.pipeline_mode<synchronous>, transform_indices = @transform_4, window_bounds = array<i64: 1, 16>}, {transform_indices = @transform_5, window_bounds = array<i64: 256, 1>}]} {
    %c0 = arith.constant 0 : index
    %c0_0 = arith.constant 0 : index
    %0 = vector.load %arg1[%c0, %c0_0] : memref<256x16xf32, #tpu.memory_space<vmem>>, vector<256x16xf32>
    %c0_1 = arith.constant 0 : index
    %c0_2 = arith.constant 0 : index
    %1 = vector.load %arg3[%c0_1, %c0_2] : memref<2x16xf32, #tpu.memory_space<vmem>>, vector<1x16xf32>
    %2 = vector.broadcast %1 : vector<1x16xf32> to vector<256x16xf32>
    %3 = arith.mulf %0, %2 : vector<256x16xf32>
    %c1 = arith.constant 1 : index
    %c0_3 = arith.constant 0 : index
    %4 = vector.load %arg3[%c1, %c0_3] : memref<2x16xf32, #tpu.memory_space<vmem>>, vector<1x16xf32>
    %5 = vector.broadcast %4 : vector<1x16xf32> to vector<256x16xf32>
    %6 = arith.addf %3, %5 : vector<256x16xf32>
    %c0_4 = arith.constant 0 : index
    %c0_5 = arith.constant 0 : index
    %7 = vector.load %arg2[%c0_4, %c0_5] : memref<256x16xf32, #tpu.memory_space<vmem>>, vector<256x16xf32>
    %c0_6 = arith.constant 0 : index
    %c0_7 = arith.constant 0 : index
    %8 = vector.load %arg4[%c0_6, %c0_7] : memref<2x16xf32, #tpu.memory_space<vmem>>, vector<1x16xf32>
    %9 = vector.broadcast %8 : vector<1x16xf32> to vector<256x16xf32>
    %10 = arith.mulf %7, %9 : vector<256x16xf32>
    %c1_8 = arith.constant 1 : index
    %c0_9 = arith.constant 0 : index
    %11 = vector.load %arg4[%c1_8, %c0_9] : memref<2x16xf32, #tpu.memory_space<vmem>>, vector<1x16xf32>
    %12 = vector.broadcast %11 : vector<1x16xf32> to vector<256x16xf32>
    %13 = arith.addf %10, %12 : vector<256x16xf32>
    %14 = arith.addf %6, %13 : vector<256x16xf32>
    %cst = arith.constant 0.000000e+00 : f32
    %15 = vector.broadcast %cst : f32 to vector<256x16xf32>
    %16 = arith.maximumf %14, %15 : vector<256x16xf32>
    %c0_10 = arith.constant 0 : index
    %c0_11 = arith.constant 0 : index
    %17 = vector.load %arg5[%c0_10, %c0_11] : memref<1x16xf32, #tpu.memory_space<vmem>>, vector<1x16xf32>
    %18 = vector.broadcast %17 : vector<1x16xf32> to vector<256x16xf32>
    %19 = arith.mulf %16, %18 : vector<256x16xf32>
    %cst_12 = arith.constant dense<0.000000e+00> : vector<256xf32>
    %20 = vector.multi_reduction <add>, %19, %cst_12 [1] : vector<256x16xf32> to vector<256xf32>
    %21 = vector.shape_cast %20 : vector<256xf32> to vector<256x1xf32>
    %c0_13 = arith.constant 0 : index
    %c0_14 = arith.constant 0 : index
    %22 = vector.load %arg6[%c0_13, %c0_14] : memref<256x1xf32, #tpu.memory_space<vmem>>, vector<256x1xf32>
    tpu.vector_store %arg6[%c0_13, %c0_14], %21 {strides = array<i32>} : memref<256x1xf32, #tpu.memory_space<vmem>>, vector<256x1xf32>,
    return
  }
  func.func @transform_0(%arg0: i32) -> (i32, i32) {
    %c0_i32 = arith.constant 0 : i32
    %c0_i32_0 = arith.constant 0 : i32
    return %arg0, %c0_i32 : i32, i32
  }
  func.func @transform_1(%arg0: i32) -> (i32, i32) {
    %c0_i32 = arith.constant 0 : i32
    %c0_i32_0 = arith.constant 0 : i32
    return %arg0, %c0_i32 : i32, i32
  }
  func.func @transform_2(%arg0: i32) -> (i32, i32) {
    %c0_i32 = arith.constant 0 : i32
    %c0_i32_0 = arith.constant 0 : i32
    %c0_i32_1 = arith.constant 0 : i32
    return %c0_i32, %c0_i32_0 : i32, i32
  }
  func.func @transform_3(%arg0: i32) -> (i32, i32) {
    %c0_i32 = arith.constant 0 : i32
    %c0_i32_0 = arith.constant 0 : i32
    %c0_i32_1 = arith.constant 0 : i32
    return %c0_i32, %c0_i32_0 : i32, i32
  }
  func.func @transform_4(%arg0: i32) -> (i32, i32) {
    %c0_i32 = arith.constant 0 : i32
    %c0_i32_0 = arith.constant 0 : i32
    %c0_i32_1 = arith.constant 0 : i32
    return %c0_i32, %c0_i32_0 : i32, i32
  }
  func.func @transform_5(%arg0: i32) -> (i32, i32) {
    %c0_i32 = arith.constant 0 : i32
    %c0_i32_0 = arith.constant 0 : i32
    return %arg0, %c0_i32 : i32, i32
  }
}

module attributes {stable_mosaic.version = 11 : i64} {
  func.func @_pass3_kernel(%arg0: i32, %arg1: memref<256x32xf32, #tpu.memory_space<vmem>>, %arg2: memref<256x1xf32, #tpu.memory_space<vmem>>, %arg3: memref<2xf32, #tpu.memory_space<smem>>, %arg4: memref<256x32xf32, #tpu.memory_space<vmem>>) attributes {dimension_semantics = [#tpu.dimension_semantics<parallel>], iteration_bounds = array<i64: 2>, scalar_prefetch = 0 : i64, scratch_operands = 0 : i64, tpu.core_type = #tpu.core_type<tc>, window_params = [{transform_indices = @transform_0, window_bounds = array<i64: 256, 32>}, {transform_indices = @transform_1, window_bounds = array<i64: 256, 1>}, {transform_indices = @transform_2, window_bounds = array<i64: 2>}, {transform_indices = @transform_3, window_bounds = array<i64: 256, 32>}]} {
    %c0 = arith.constant 0 : index
    %c0_0 = arith.constant 0 : index
    %0 = vector.load %arg2[%c0, %c0_0] : memref<256x1xf32, #tpu.memory_space<vmem>>, vector<256x1xf32>
    %c0_1 = arith.constant 0 : index
    %1 = memref.load %arg3[%c0_1] : memref<2xf32, #tpu.memory_space<smem>>
    %2 = vector.broadcast %1 : f32 to vector<256x1xf32>
    %3 = arith.mulf %0, %2 : vector<256x1xf32>
    %c1 = arith.constant 1 : index
    %4 = memref.load %arg3[%c1] : memref<2xf32, #tpu.memory_space<smem>>
    %5 = vector.broadcast %4 : f32 to vector<256x1xf32>
    %6 = arith.addf %3, %5 : vector<256x1xf32>
    %cst = arith.constant 0.000000e+00 : f32
    %7 = vector.broadcast %cst : f32 to vector<256x1xf32>
    %8 = arith.subf %7, %6 : vector<256x1xf32>
    %9 = math.exp %8 : vector<256x1xf32>
    %cst_2 = arith.constant 1.000000e+00 : f32
    %10 = vector.broadcast %cst_2 : f32 to vector<256x1xf32>
    %11 = arith.addf %10, %9 : vector<256x1xf32>
    %cst_3 = arith.constant 1.000000e+00 : f32
    %12 = vector.broadcast %cst_3 : f32 to vector<256x1xf32>
    %13 = arith.divf %12, %11 : vector<256x1xf32>
    %c0_4 = arith.constant 0 : index
    %c0_5 = arith.constant 0 : index
    %14 = vector.load %arg1[%c0_4, %c0_5] : memref<256x32xf32, #tpu.memory_space<vmem>>, vector<256x32xf32>
    %15 = vector.broadcast %13 : vector<256x1xf32> to vector<256x32xf32>
    %16 = arith.mulf %14, %15 : vector<256x32xf32>
    %c0_6 = arith.constant 0 : index
    %c0_7 = arith.constant 0 : index
    %17 = vector.load %arg4[%c0_6, %c0_7] : memref<256x32xf32, #tpu.memory_space<vmem>>, vector<256x32xf32>
    tpu.vector_store %arg4[%c0_6, %c0_7], %16 {strides = array<i32>} : memref<256x32xf32, #tpu.memory_space<vmem>>, vector<256x32xf32>,
    return
  }
  func.func @transform_0(%arg0: i32) -> (i32, i32) {
    %c0_i32 = arith.constant 0 : i32
    %c0_i32_0 = arith.constant 0 : i32
    return %arg0, %c0_i32 : i32, i32
  }
  func.func @transform_1(%arg0: i32) -> (i32, i32) {
    %c0_i32 = arith.constant 0 : i32
    %c0_i32_0 = arith.constant 0 : i32
    return %arg0, %c0_i32 : i32, i32
  }
  func.func @transform_2(%arg0: i32) -> i32 {
    %c0_i32 = arith.constant 0 : i32
    %c0_i32_0 = arith.constant 0 : i32
    return %c0_i32 : i32
  }
  func.func @transform_3(%arg0: i32) -> (i32, i32) {
    %c0_i32 = arith.constant 0 : i32
    %c0_i32_0 = arith.constant 0 : i32
    return %arg0, %c0_i32 : i32, i32
  }
}

</mosaic_0001>

<bundles_post_ra>
// kernel: attention_block_forward.5
= control target key start
LH: loop header
LB: loop body
LE: loop exit
PB: predicated region body
PF: predicated region fallthrough
CT: control target
= control target key end

     0   :  { %8 = vsyncpa [#allocation4], 0  ;;  %s1506_s0 = inlined_call_operand.vmem [shape: f32[512,32], index: 0, kind: input, shape index: {}]   ;;  %s1507_s1 = inlined_call_operand.vmem [shape: f32[512,1], index: 1, kind: input, shape index: {}]   ;;  %s1508_s2 = inlined_call_operand.vmem [shape: f32[2], index: 2, kind: input, shape index: {}]   ;;  %s1509_s3 = inlined_call_operand.hbm [shape: f32[512,32], index: 3, kind: output, shape index: {}]  }
   0x1   :  { %9 = vsyncpa [#allocation3], 0 }
   0x2   :  { %11 = vsyncpa [#allocation3 + $0x1], 0  ;;  %s1166_s12 = smov 0   ;;  %s1168_s13 = smov 0  }
   0x3   :  { %s1170_s14 = smov 0   ;;  %s1172_s15 = smov 0  }
   0x4 LB: > { %s1187_s16 = sadd.s32 4294967295, %s1139_s15   ;;  %s857_s17 = sadd.s32 4294967294, %s1139_s15   ;;  %s1139_s15 = sphi %s1172_s15, %s1516_s15   ;;  %s1135_s14 = sphi %s1170_s14, %s1515_s14   ;;  %s1131_s13 = sphi %s1168_s13, %s1514_s13   ;;  %s1127_s12 = sphi %s1166_s12, %s1513_s12  }
   0x5   : > { %s1191_s18 = sadd.s32 1, %s1139_s15   ;;  %s97_s19 = sadd.s32 1, %s1135_s14 }
   0x6   : > { %s94_s20 = ssub.s32 %s1139_s15, %s1191_s18  ;;  %p107_p0 = scmp.ne.s32.totalorder %s1135_s14, %s1131_s13 }
   0x7   : > { %p95_p1 = scmp.eq.s32.totalorder %s94_s20, 0  ;;  %p108_p2 = scmp.eq.s32.totalorder %s1187_s16, 1 }
   0x8   : > { %p113_p3 = scmp.ne.s32.totalorder %s1131_s13, %s1127_s12  ;;  %p114_p4 = scmp.eq.s32.totalorder %s857_s17, 1 }
   0x9   : > { %s1202_s21 = scalar_select %p95_p1, %s1135_s14, %s97_s19  }
   0xa   : > { %p1204_p5 = por %p108_p2, %p107_p0  ;;  %p1208_p6 = por %p114_p4, %p113_p3 }
   0xb   : > { %p858_p7 = scmp.ge.s32.totalorder %s1139_s15, 1  ;;  %p121_p8 = scmp.lt.s32.totalorder %s1139_s15, 3 }
   0xc   : > { %p889_p9 = scmp.eq.s32.totalorder %s1187_s16, 0  ;;  %s134_s27 = sshll.u32 %s1508_s2, 4  ;;  %s135_s27 = int_to_ptr.vmem [resolvable:$true] %s134_s27 }
   0xd   : > { %p1215_p10 = pnand %p858_p7, %p121_p8  ;;  %s1058_s28 = scalar_lea.vmem %s135_s27, 16 }
   0xe   : > { %p1059_p13 = scmp.ne.s32.totalorder %s135_s27, %s1058_s28  ;;  %p1066_p3 = scmp.lt.s32.totalorder %s135_s27, %s135_s27 }
   0xf   : > { %p881_p11 = pneg %p1215_p10  ;;  %p1067_p4 = scmp.lt.s32.totalorder %s1058_s28, %s1058_s28 }
  0x11   : > { %p882_p12 = pnand %p889_p9, %p881_p11  ;;  %p1068_p7 = por %p1067_p4, %p1066_p3 }
  0x13   : > { %p1060_p0 = pneg %p882_p12 }
  0x15   : > { %p1061_p1 = pnand %p1060_p0, %p1059_p13 }
  0x17   : > { %p1062_p2 = pneg %p1061_p1 }
  0x19   : > { %p1069_p8 = pnand %p1068_p7, %p1062_p2 }
  0x1b   : > { %1072 = shalt.err (!%p1069_p8)
}
  0x1c   : > { %s1141_s29 = smov [#allocation2]   ;;  %165 = sbr.rel (%p1215_p10) target bundleno = 284 (0x11c), region = 32 }
  0x1d   : > { %884 = dma.vmem_to_smem (!%p882_p12), %s135_s27, 16, %s1141_s29, [#allocation4]  }
  0x23   : > { %1118 = dma.done.wait (%p889_p9), [#allocation4], 16  }
  0x24   : > { %1120 = vsyncadd (%p889_p9), [#allocation4], 4294967280 }
  0x25   : > { %171 = sfence }
  0x26   : > { %s864_s30 = sshll.u32 %s1187_s16, 5  ;;  %s240_s4 = sld [smem:[#allocation2]]  ;;  %v1142_v0 = vmov 0   ;;  %vm724_vm0 = vcmask 261120  }
  0x27   : > { %929 = vset.pattern.permute.xlu1 %v1142_v0  ;;  %928 = vset.pattern.permute.xlu0 %v1142_v0  ;;  %p196_p11 = scmp.lt.s32.totalorder %s864_s30, 63  ;;  %s868_s5 = sld [smem:[#allocation2 + $0x1]] }
  0x28   : > { %s192_s10 = sand.u32 1, %s1131_s13   ;;  %s874_s25 = sshll.u32 %s1187_s16, 12 }
  0x29   : > { %s1518_s30 = smov (!%p196_p11, %s864_s30), 63  ;;  %s863_s20 = sshll.u32 %s192_s10, 8 }
  0x2a   : > { %s865_s6 = sshll.u32 %s1518_s30, 3  ;;  %s1359_s24 = scalar_lea.vmem [#allocation5], %s863_s20 }
  0x2b   : > { %s1241_s9 = scalar_lea.vmem %s1507_s1, %s865_s6  ;;  %s1352_s19 = scalar_lea.vmem %s1506_s0, %s865_s6 }
  0x2c   : > { %v1243_v1 = vstv %s240_s4  ;;  %v210_v2 = vld [vmem:[%s1241_s9 + $0x10] sm:$0xff]  ;;  %v208_v4 = vld [vmem:[%s1241_s9] sm:$0xff]  ;;  %v211_v5 = vld [vmem:[%s1241_s9 + $0x18] sm:$0xff]  ;;  %s771_s26 = sshll.u32 %s1359_s24, 4  ;;  %s1455_s29 = scalar_lea.hbm %s1509_s3, %s874_s25  ;;  %s1457_s26 = int_to_ptr.vmem [resolvable:$true] %s771_s26 }
  0x2d   : > { %v1246_v3 = vstv %s868_s5  ;;  %v244_v6 = vmul.f32 %v1243_v1, %v210_v2  ;;  %v242_v7 = vmul.f32 %v1243_v1, %v208_v4  ;;  %v245_v8 = vmul.f32 %v1243_v1, %v211_v5  ;;  %v209_v9 = vld [vmem:[%s1241_s9 + $0x8] sm:$0xff]  ;;  %v212_v11 = vld [vmem:[%s1241_s9 + $0x20] sm:$0xff]  ;;  %v215_v15 = vld [vmem:[%s1241_s9 + $0x38] sm:$0xff]  ;;  %s1465_s16 = scalar_lea.sflag [#allocation3], %s192_s10  ;;  %s1073_s30 = scalar_lea.vmem %s1457_s26, 4096 }
  0x2e   : > { %v213_v10 = vld [vmem:[%s1241_s9 + $0x28] sm:$0xff]  ;;  %v243_v12 = vmul.f32 %v1243_v1, %v209_v9  ;;  %v246_v14 = vmul.f32 %v1243_v1, %v212_v11  ;;  %v214_v16 = vld [vmem:[%s1241_s9 + $0x30] sm:$0xff]  ;;  %v249_v20 = vmul.f32 %v1243_v1, %v215_v15  ;;  %v216_v30 = vld [vmem:[%s1241_s9 + $0x40] sm:$0xff]  ;;  %p1074_p9 = scmp.ne.s32.totalorder %s1457_s26, %s1073_s30  ;;  %s1143_s4 = smov [#allocation5]  }
  0x2f   : > { %v247_v13 = vmul.f32 %v1243_v1, %v213_v10  ;;  %v278_v17 = vadd.f32 %v1246_v3, %v244_v6  ;;  %v276_v18 = vadd.f32 %v1246_v3, %v242_v7  ;;  %v279_v19 = vadd.f32 %v1246_v3, %v245_v8  ;;  %v217_v25 = vld [vmem:[%s1241_s9 + $0x48] sm:$0xff]  ;;  %v219_v35 = vld [vmem:[%s1241_s9 + $0x58] sm:$0xff]  ;;  %v218_v36 = vld [vmem:[%s1241_s9 + $0x50] sm:$0xff]  ;;  %s1077_s5 = sshll.u32 %s1143_s4, 4  ;;  %s1078_s5 = int_to_ptr.vmem [resolvable:$false] %s1077_s5 }
  0x30   : > { %v277_v21 = vadd.f32 %v1246_v3, %v243_v12  ;;  %v280_v23 = vadd.f32 %v1246_v3, %v246_v14  ;;  %v248_v24 = vmul.f32 %v1243_v1, %v214_v16  ;;  %v283_v29 = vadd.f32 %v1246_v3, %v249_v20  ;;  %v221_v51 = vld [vmem:[%s1241_s9 + $0x68] sm:$0xff]  ;;  %v220_v52 = vld [vmem:[%s1241_s9 + $0x60] sm:$0xff]  ;;  %v223_v62 = vld [vmem:[%s1241_s9 + $0x78] sm:$0xff]  ;;  %p1075_p10 = pnand %p1074_p9, %p1204_p5  ;;  %s1079_s6 = scalar_lea.vmem %s1078_s5, 8192 }
  0x31   : > { %v281_v22 = vadd.f32 %v1246_v3, %v247_v13  ;;  %v310_v26 = vsub.f32 0.0, %v278_v17  ;;  %v308_v27 = vsub.f32 0.0, %v276_v18  ;;  %v311_v28 = vsub.f32 0.0, %v279_v19  ;;  %v222_v9 = vld [vmem:[%s1241_s9 + $0x70] sm:$0xff]  ;;  %v225_v11 = vld [vmem:[%s1241_s9 + $0x88] sm:$0xff]  ;;  %v224_v16 = vld [vmem:[%s1241_s9 + $0x80] sm:$0xff]  ;;  %p1080_p13 = scmp.lt.s32.totalorder %s1457_s26, %s1078_s5  ;;  %p1081_p0 = scmp.lt.s32.totalorder %s1079_s6, %s1073_s30 }
  0x32   : > { %v309_v31 = vsub.f32 0.0, %v277_v21  ;;  %v312_v33 = vsub.f32 0.0, %v280_v23  ;;  %v282_v34 = vadd.f32 %v1246_v3, %v248_v24  ;;  %v251_v40 = vmul.f32 %v1243_v1, %v217_v25  ;;  %v227_v23 = vld [vmem:[%s1241_s9 + $0x98] sm:$0xff]  ;;  %p1076_p12 = pneg %p1075_p10 }
  0x33   : > { %v313_v32 = vsub.f32 0.0, %v281_v22  ;;  %v344_v37 = vmul.f32 1.442695, %v310_v26  ;;  %v340_v38 = vmul.f32 1.442695, %v308_v27  ;;  %v250_v44 = vmul.f32 %v1243_v1, %v216_v30  ;;  %v226_v27 = vld [vmem:[%s1241_s9 + $0x90] sm:$0xff]  ;;  %p1082_p1 = por %p1081_p0, %p1080_p13 }
  0x34   : > { %v346_v39 = vmul.f32 1.442695, %v311_v28  ;;  %v342_v41 = vmul.f32 1.442695, %v309_v31  ;;  %v348_v43 = vmul.f32 1.442695, %v312_v33  ;;  %v285_v47 = vadd.f32 %v1246_v3, %v251_v40 }
  0x35   : > { %v350_v42 = vmul.f32 1.442695, %v313_v32  ;;  %930 = vpow2.f32 %v344_v37  ;;  %v315_v45 = vsub.f32 0.0, %v283_v29  ;;  %v314_v46 = vsub.f32 0.0, %v282_v34  ;;  %v229_v32 = vld [vmem:[%s1241_s9 + $0xa8] sm:$0xff]  ;;  %v228_v37 = vld [vmem:[%s1241_s9 + $0xa0] sm:$0xff]  ;;  %p1083_p2 = pnand %p1082_p1, %p1076_p12 }
  0x36   : > { %932 = vpow2.f32 %v340_v38  ;;  %v284_v48 = vadd.f32 %v1246_v3, %v250_v44  ;;  %v253_v49 = vmul.f32 %v1243_v1, %v219_v35  ;;  %v252_v50 = vmul.f32 %v1243_v1, %v218_v36 }
  0x37   : > { %934 = vpow2.f32 %v346_v39  ;;  %v354_v53 = vmul.f32 1.442695, %v315_v45  ;;  %v352_v54 = vmul.f32 1.442695, %v314_v46  ;;  %v317_v55 = vsub.f32 0.0, %v285_v47 }
  0x38   : > { %936 = vpow2.f32 %v342_v41  ;;  %v316_v56 = vsub.f32 0.0, %v284_v48  ;;  %v287_v57 = vadd.f32 %v1246_v3, %v253_v49  ;;  %v286_v58 = vadd.f32 %v1246_v3, %v252_v50 }
  0x39   : > { %938 = vpow2.f32 %v350_v42  ;;  %v358_v59 = vmul.f32 1.442695, %v317_v55  ;;  %v255_v60 = vmul.f32 %v1243_v1, %v221_v51  ;;  %v254_v61 = vmul.f32 %v1243_v1, %v220_v52 }
  0x3a   : > { %940 = vpow2.f32 %v348_v43  ;;  %v356_v63 = vmul.f32 1.442695, %v316_v56  ;;  %v319_v0 = vsub.f32 0.0, %v287_v57  ;;  %v318_v2 = vsub.f32 0.0, %v286_v58 }
  0x3b   : > { %942 = vpow2.f32 %v354_v53  ;;  %v289_v4 = vadd.f32 %v1246_v3, %v255_v60  ;;  %v288_v5 = vadd.f32 %v1246_v3, %v254_v61  ;;  %v257_v8 = vmul.f32 %v1243_v1, %v223_v62 }
  0x3c   : > { %944 = vpow2.f32 %v352_v54  ;;  %v362_v6 = vmul.f32 1.442695, %v319_v0  ;;  %v360_v7 = vmul.f32 1.442695, %v318_v2  ;;  %v256_v15 = vmul.f32 %v1243_v1, %v222_v9  ;;  %v231_v54 = vld [vmem:[%s1241_s9 + $0xb8] sm:$0xff] }
  0x3d   : > { %946 = vpow2.f32 %v358_v59  ;;  %v321_v10 = vsub.f32 0.0, %v289_v4  ;;  %v320_v14 = vsub.f32 0.0, %v288_v5  ;;  %v291_v19 = vadd.f32 %v1246_v3, %v257_v8  ;;  %v230_v59 = vld [vmem:[%s1241_s9 + $0xb0] sm:$0xff] }
  0x3e   : > { %948 = vpow2.f32 %v356_v63  ;;  %v259_v22 = vmul.f32 %v1243_v1, %v225_v11  ;;  %v258_v26 = vmul.f32 %v1243_v1, %v224_v16  ;;  %v290_v31 = vadd.f32 %v1246_v3, %v256_v15 }
  0x3f   : > { %v931_v12 = vpop.eup %930  ;;  %950 = vpow2.f32 %v362_v6  ;;  %v366_v13 = vmul.f32 1.442695, %v321_v10  ;;  %v1300_v30 = vmul.f32 1.442695, %v320_v14  ;;  %v323_v35 = vsub.f32 0.0, %v291_v19  ;;  %v233_v10 = vld [vmem:[%s1241_s9 + $0xc8] sm:$0xff] }
  0x40   : > { %v933_v17 = vpop.eup %932  ;;  %v406_v18 = vadd.f32 1.0, %v931_v12  ;;  %952 = vpow2.f32 %v360_v7  ;;  %v261_v36 = vmul.f32 %v1243_v1, %v227_v23  ;;  %v293_v40 = vadd.f32 %v1246_v3, %v259_v22  ;;  %v232_v19 = vld [vmem:[%s1241_s9 + $0xc0] sm:$0xff] }
  0x41   : > { %v935_v20 = vpop.eup %934  ;;  %v404_v21 = vadd.f32 1.0, %v933_v17  ;;  %954 = vpow2.f32 %v366_v13  ;;  %v260_v41 = vmul.f32 %v1243_v1, %v226_v27  ;;  %v292_v44 = vadd.f32 %v1246_v3, %v258_v26 }
  0x42   : > { %v937_v24 = vpop.eup %936  ;;  %956 = vrcp.f32 %v406_v18  ;;  %v407_v25 = vadd.f32 1.0, %v935_v20  ;;  %v263_v45 = vmul.f32 %v1243_v1, %v229_v32  ;;  %v322_v48 = vsub.f32 0.0, %v290_v31 }
  0x43   : > { %v939_v28 = vpop.eup %938  ;;  %958 = vrcp.f32 %v404_v21  ;;  %v405_v29 = vadd.f32 1.0, %v937_v24  ;;  %v262_v49 = vmul.f32 %v1243_v1, %v228_v37  ;;  %v370_v52 = vmul.f32 1.442695, %v323_v35 }
  0x44   : > { %v941_v33 = vpop.eup %940  ;;  %960 = vrcp.f32 %v407_v25  ;;  %v409_v34 = vadd.f32 1.0, %v939_v28  ;;  %v295_v53 = vadd.f32 %v1246_v3, %v261_v36  ;;  %v325_v57 = vsub.f32 0.0, %v293_v40 }
  0x45   : > { %v943_v38 = vpop.eup %942  ;;  %962 = vrcp.f32 %v405_v29  ;;  %v408_v39 = vadd.f32 1.0, %v941_v33  ;;  %v294_v58 = vadd.f32 %v1246_v3, %v260_v41  ;;  %v324_v62 = vsub.f32 0.0, %v292_v44  ;;  %v235_v41 = vld [vmem:[%s1241_s9 + $0xd8] sm:$0xff] }
  0x46   : > { %v945_v42 = vpop.eup %944  ;;  %964 = vrcp.f32 %v409_v34  ;;  %v411_v43 = vadd.f32 1.0, %v943_v38  ;;  %v297_v63 = vadd.f32 %v1246_v3, %v263_v45  ;;  %v296_v4 = vadd.f32 %v1246_v3, %v262_v49  ;;  %v234_v45 = vld [vmem:[%s1241_s9 + $0xd0] sm:$0xff] }
  0x47   : > { %v947_v46 = vpop.eup %946  ;;  %966 = vrcp.f32 %v408_v39  ;;  %v410_v47 = vadd.f32 1.0, %v945_v42  ;;  %v265_v5 = vmul.f32 %v1243_v1, %v231_v54  ;;  %v327_v8 = vsub.f32 0.0, %v295_v53 }
  0x48   : > { %v949_v50 = vpop.eup %948  ;;  %968 = vrcp.f32 %v411_v43  ;;  %v413_v51 = vadd.f32 1.0, %v947_v46  ;;  %v264_v9 = vmul.f32 %v1243_v1, %v230_v59  ;;  %v368_v12 = vmul.f32 1.442695, %v322_v48  ;;  %v237_v48 = vld [vmem:[%s1241_s9 + $0xe8] sm:$0xff] }
  0x49   : > { %v951_v55 = vpop.eup %950  ;;  %970 = vrcp.f32 %v410_v47  ;;  %v412_v56 = vadd.f32 1.0, %v949_v50  ;;  %v326_v13 = vsub.f32 0.0, %v294_v58  ;;  %v299_v14 = vadd.f32 %v1246_v3, %v265_v5 }
  0x4a   : > { %v953_v60 = vpop.eup %952  ;;  %972 = vrcp.f32 %v413_v51  ;;  %v415_v61 = vadd.f32 1.0, %v951_v55  ;;  %v374_v16 = vmul.f32 1.442695, %v325_v57  ;;  %v329_v17 = vsub.f32 0.0, %v297_v63  ;;  %v236_v51 = vld [vmem:[%s1241_s9 + $0xe0] sm:$0xff]  ;;  %v239_v55 = vld [vmem:[%s1241_s9 + $0xf8] sm:$0xff] }
  0x4b   : > { %v955_v0 = vpop.eup %954  ;;  %974 = vrcp.f32 %v412_v56  ;;  %v414_v2 = vadd.f32 1.0, %v953_v60  ;;  %v298_v18 = vadd.f32 %v1246_v3, %v264_v9  ;;  %v372_v21 = vmul.f32 1.442695, %v324_v62  ;;  %v238_v60 = vld [vmem:[%s1241_s9 + $0xf0] sm:$0xff] }
  0x4c   : > { %v957_v6 = vpop.eup %956  ;;  %976 = vrcp.f32 %v415_v61  ;;  %v417_v7 = vadd.f32 1.0, %v955_v0  ;;  %v328_v22 = vsub.f32 0.0, %v296_v4  ;;  %v267_v23 = vmul.f32 %v1243_v1, %v233_v10 }
  0x4d   : > { %v959_v11 = vpop.eup %958  ;;  %544 = vperm.xlu1 %929, %v957_v6   ;;  %978 = vrcp.f32 %v414_v2  ;;  %v378_v25 = vmul.f32 1.442695, %v327_v8  ;;  %v331_v26 = vsub.f32 0.0, %v299_v14  ;;  %v376_v28 = vmul.f32 1.442695, %v326_v13 }
  0x4e   : > { %v961_v15 = vpop.eup %960  ;;  %534 = vperm.xlu0 %928, %v959_v11   ;;  %980 = vrcp.f32 %v417_v7  ;;  %v330_v29 = vsub.f32 0.0, %v298_v18  ;;  %v266_v31 = vmul.f32 %v1243_v1, %v232_v19  ;;  %v380_v34 = vmul.f32 1.442695, %v328_v22 }
  0x4f   : > { %v963_v20 = vpop.eup %962  ;;  %982 = vpow2.f32 %v1300_v30  ;;  %v382_v30 = vmul.f32 1.442695, %v329_v17  ;;  %v301_v35 = vadd.f32 %v1246_v3, %v267_v23  ;;  %v386_v37 = vmul.f32 1.442695, %v331_v26 }
  0x50   : > { %v965_v24 = vpop.eup %964  ;;  %984 = vpow2.f32 %v370_v52  ;;  %v384_v39 = vmul.f32 1.442695, %v330_v29  ;;  %v300_v40 = vadd.f32 %v1246_v3, %v266_v31  ;;  %v269_v47 = vmul.f32 %v1243_v1, %v235_v41 }
  0x51   : > { %v967_v27 = vpop.eup %966  ;;  %549 = vperm.xlu1 %929, %v961_v15   ;;  %986 = vpow2.f32 %v368_v12  ;;  %v333_v44 = vsub.f32 0.0, %v301_v35  ;;  %v268_v54 = vmul.f32 %v1243_v1, %v234_v45  ;;  %v271_v59 = vmul.f32 %v1243_v1, %v237_v48 }
  0x52   : > { %v969_v32 = vpop.eup %968  ;;  %539 = vperm.xlu0 %928, %v963_v20   ;;  %988 = vpow2.f32 %v374_v16  ;;  %v332_v50 = vsub.f32 0.0, %v300_v40  ;;  %v303_v63 = vadd.f32 %v1246_v3, %v269_v47  ;;  %v270_v0 = vmul.f32 %v1243_v1, %v236_v51 }
  0x53   : > { %v971_v33 = vpop.eup %970  ;;  %990 = vpow2.f32 %v372_v21  ;;  %v390_v58 = vmul.f32 1.442695, %v333_v44  ;;  %v273_v6 = vmul.f32 %v1243_v1, %v239_v55  ;;  %v302_v9 = vadd.f32 %v1246_v3, %v268_v54 }
  0x54   : > { %v973_v36 = vpop.eup %972  ;;  %992 = vpow2.f32 %v378_v25  ;;  %v388_v5 = vmul.f32 1.442695, %v332_v50  ;;  %v272_v10 = vmul.f32 %v1243_v1, %v238_v60  ;;  %v305_v13 = vadd.f32 %v1246_v3, %v271_v59 }
  0x55   : > { %v975_v38 = vpop.eup %974  ;;  %559 = vperm.xlu1 %929, %v965_v24   ;;  %994 = vpow2.f32 %v376_v28  ;;  %v304_v16 = vadd.f32 %v1246_v3, %v270_v0  ;;  %v335_v19 = vsub.f32 0.0, %v303_v63  ;;  %v307_v20 = vadd.f32 %v1246_v3, %v273_v6 }
  0x56   : > { %v977_v42 = vpop.eup %976  ;;  %554 = vperm.xlu0 %928, %v967_v27   ;;  %996 = vpow2.f32 %v382_v30  ;;  %v334_v22 = vsub.f32 0.0, %v302_v9  ;;  %v306_v23 = vadd.f32 %v1246_v3, %v272_v10  ;;  %v337_v26 = vsub.f32 0.0, %v305_v13  ;;  %v502_v9 = vld [vmem:[%s1352_s19 + $0x10] sm:$0xff]  ;;  %v500_v10 = vld [vmem:[%s1352_s19] sm:$0xff] }
  0x57   : > { %v979_v43 = vpop.eup %978  ;;  %998 = vpow2.f32 %v380_v34  ;;  %v336_v28 = vsub.f32 0.0, %v304_v16  ;;  %v394_v29 = vmul.f32 1.442695, %v335_v19  ;;  %v339_v31 = vsub.f32 0.0, %v307_v20  ;;  %v501_v16 = vld [vmem:[%s1352_s19 + $0x8] sm:$0xff] }
  0x58   : > { %v981_v46 = vpop.eup %980  ;;  %1000 = vpow2.f32 %v386_v37  ;;  %v392_v30 = vmul.f32 1.442695, %v334_v22  ;;  %v398_v35 = vmul.f32 1.442695, %v337_v26  ;;  %v507_v26 = vld [vmem:[%s1352_s19 + $0x38] sm:$0xff] }
  0x59   : > { %v983_v49 = vpop.eup %982  ;;  %569 = vperm.xlu1 %929, %v969_v32   ;;  %1002 = vpow2.f32 %v384_v39 }
  0x5a   : > { %v985_v52 = vpop.eup %984  ;;  %564 = vperm.xlu0 %928, %v971_v33   ;;  %v416_v53 = vadd.f32 1.0, %v983_v49  ;;  %v338_v33 = vsub.f32 0.0, %v306_v23 }
  0x5b   : > { %v987_v56 = vpop.eup %986  ;;  %v419_v57 = vadd.f32 1.0, %v985_v52 }
  0x5c   : > { %v989_v61 = vpop.eup %988  ;;  %1004 = vrcp.f32 %v416_v53  ;;  %v418_v62 = vadd.f32 1.0, %v987_v56  ;;  %v400_v40 = vmul.f32 1.442695, %v338_v33  ;;  %v508_v33 = vld [vmem:[%s1352_s19 + $0x40] sm:$0xff] }
  0x5d   : > { %v991_v2 = vpop.eup %990  ;;  %579 = vperm.xlu1 %929, %v973_v36   ;;  %1006 = vrcp.f32 %v419_v57  ;;  %v421_v4 = vadd.f32 1.0, %v989_v61  ;;  %v396_v36 = vmul.f32 1.442695, %v336_v28 }
  0x5e   : > { %v993_v7 = vpop.eup %992  ;;  %574 = vperm.xlu0 %928, %v975_v38   ;;  %1008 = vrcp.f32 %v418_v62  ;;  %v420_v8 = vadd.f32 1.0, %v991_v2  ;;  %v402_v38 = vmul.f32 1.442695, %v339_v31 }
  0x5f   : > { %v995_v11 = vpop.eup %994  ;;  %v423_v12 = vadd.f32 1.0, %v993_v7  ;;  %1010 = vpow2.f32 %v390_v58 }
  0x60   : > { %v997_v14 = vpop.eup %996  ;;  %1012 = vrcp.f32 %v421_v4  ;;  %v422_v15 = vadd.f32 1.0, %v995_v11 }
  0x61   : > { %v999_v17 = vpop.eup %998  ;;  %589 = vperm.xlu1 %929, %v977_v42   ;;  %v425_v18 = vadd.f32 1.0, %v997_v14  ;;  %1014 = vpow2.f32 %v388_v5 }
  0x62   : > { %v1001_v21 = vpop.eup %1000  ;;  %584 = vperm.xlu0 %928, %v979_v43   ;;  %1016 = vrcp.f32 %v420_v8  ;;  %v424_v1 = vadd.f32 1.0, %v999_v17 }
  0x63   : > { %v1003_v24 = vpop.eup %1002  ;;  %1018 = vrcp.f32 %v423_v12  ;;  %v427_v25 = vadd.f32 1.0, %v1001_v21  ;;  %v505_v21 = vld [vmem:[%s1352_s19 + $0x28] sm:$0xff] }
  0x64   : > { %1020 = vrcp.f32 %v422_v15  ;;  %v426_v27 = vadd.f32 1.0, %v1003_v24  ;;  %v503_v15 = vld [vmem:[%s1352_s19 + $0x18] sm:$0xff] }
  0x65   : > { %599 = vperm.xlu1 %929, %v981_v46   ;;  %1022 = vrcp.f32 %v425_v18 }
  0x66   : > { %v1005_v32 = vpop.eup %1004  ;;  %1024 = vrcp.f32 %v424_v1  ;;  %v504_v1 = vld [vmem:[%s1352_s19 + $0x20] sm:$0xff] }
  0x67   : > { %v1007_v34 = vpop.eup %1006  ;;  %594 = vperm.xlu0 %928, %v1005_v32   ;;  %1026 = vrcp.f32 %v427_v25 }
  0x68   : > { %v1009_v3 = vpop.eup %1008  ;;  %1028 = vrcp.f32 %v426_v27  ;;  %v506_v27 = vld [vmem:[%s1352_s19 + $0x30] sm:$0xff] }
  0x69   : > { %v1011_v37 = vpop.eup %1010  ;;  %609 = vperm.xlu1 %929, %v1007_v34   ;;  %1030 = vpow2.f32 %v394_v29 }
  0x6a   : > { %v1013_v39 = vpop.eup %1012  ;;  %1032 = vpow2.f32 %v392_v30  ;;  %v429_v43 = vadd.f32 1.0, %v1011_v37  ;;  %v509_v30 = vld [vmem:[%s1352_s19 + $0x48] sm:$0xff]  ;;  %v511_v37 = vld [vmem:[%s1352_s19 + $0x58] sm:$0xff] }
  0x6b   : > { %v1015_v41 = vpop.eup %1014  ;;  %604 = vperm.xlu0 %928, %v1009_v3   ;;  %1034 = vpow2.f32 %v398_v35 }
  0x6c   : > { %v1017_v42 = vpop.eup %1016  ;;  %1036 = vpow2.f32 %v396_v36  ;;  %v428_v46 = vadd.f32 1.0, %v1015_v41 }
  0x6d   : > { %v1019_v44 = vpop.eup %1018  ;;  %619 = vperm.xlu1 %929, %v1013_v39   ;;  %1038 = vpow2.f32 %v402_v38  ;;  %v510_v38 = vld [vmem:[%s1352_s19 + $0x50] sm:$0xff] }
  0x6e   : > { %v1021_v45 = vpop.eup %1020  ;;  %1040 = vpow2.f32 %v400_v40 }
  0x6f   : > { %v1023_v47 = vpop.eup %1022  ;;  %614 = vperm.xlu0 %928, %v1017_v42   ;;  %1042 = vrcp.f32 %v429_v43  ;;  %v513_v43 = vld [vmem:[%s1352_s19 + $0x68] sm:$0xff] }
  0x70   : > { %v1025_v48 = vpop.eup %1024  ;;  %1044 = vrcp.f32 %v428_v46 }
  0x71   : > { %v1027_v49 = vpop.eup %1026  ;;  %629 = vperm.xlu1 %929, %v1019_v44  }
  0x72   : > { %v1029_v50 = vpop.eup %1028 }
  0x73   : > { %v1031_v51 = vpop.eup %1030  ;;  %624 = vperm.xlu0 %928, %v1021_v45   ;;  %v512_v45 = vld [vmem:[%s1352_s19 + $0x60] sm:$0xff] }
  0x74   : > { %v1033_v52 = vpop.eup %1032  ;;  %v431_v53 = vadd.f32 1.0, %v1031_v51  ;;  %v514_v51 = vld [vmem:[%s1352_s19 + $0x70] sm:$0xff] }
  0x75   : > { %v1035_v54 = vpop.eup %1034  ;;  %639 = vperm.xlu1 %929, %v1023_v47   ;;  %v430_v55 = vadd.f32 1.0, %v1033_v52 }
  0x76   : > { %v1037_v56 = vpop.eup %1036  ;;  %1046 = vrcp.f32 %v431_v53  ;;  %v433_v57 = vadd.f32 1.0, %v1035_v54  ;;  %v517_v54 = vld [vmem:[%s1352_s19 + $0x88] sm:$0xff] }
  0x77   : > { %v1039_v58 = vpop.eup %1038  ;;  %634 = vperm.xlu0 %928, %v1025_v48   ;;  %1048 = vrcp.f32 %v430_v55  ;;  %v432_v59 = vadd.f32 1.0, %v1037_v56  ;;  %v515_v48 = vld [vmem:[%s1352_s19 + $0x78] sm:$0xff] }
  0x78   : > { %v1041_v60 = vpop.eup %1040  ;;  %1050 = vrcp.f32 %v433_v57  ;;  %v435_v61 = vadd.f32 1.0, %v1039_v58  ;;  %v516_v57 = vld [vmem:[%s1352_s19 + $0x80] sm:$0xff] }
  0x79   : > { %649 = vperm.xlu1 %929, %v1027_v49   ;;  %v1043_v62 = vpop.eup %1042  ;;  %1052 = vrcp.f32 %v432_v59  ;;  %v434_v63 = vadd.f32 1.0, %v1041_v60  ;;  %v519_v60 = vld [vmem:[%s1352_s19 + $0x98] sm:$0xff] }
  0x7a   : > { %v1045_v0 = vpop.eup %1044  ;;  %1054 = vrcp.f32 %v435_v61 }
  0x7b   : > { %644 = vperm.xlu0 %928, %v1029_v50   ;;  %1056 = vrcp.f32 %v434_v63  ;;  %v518_v63 = vld [vmem:[%s1352_s19 + $0x90] sm:$0xff] }
  0x7d   : > { %659 = vperm.xlu1 %929, %v1043_v62  }
  0x7f   : > { %654 = vperm.xlu0 %928, %v1045_v0  }
  0x80   : > { %v1047_v2 = vpop.eup %1046 }
  0x81   : > { %v1049_v4 = vpop.eup %1048  ;;  %669 = vperm.xlu1 %929, %v1047_v2  }
  0x82   : > { %v1051_v5 = vpop.eup %1050 }
  0x83   : > { %664 = vperm.xlu0 %928, %v1049_v4   ;;  %v1053_v6 = vpop.eup %1052  ;;  %v521_v4 = vld [vmem:[%s1352_s19 + $0xa8] sm:$0xff] }
  0x84   : > { %v1055_v7 = vpop.eup %1054 }
  0x85   : > { %679 = vperm.xlu1 %929, %v1051_v5   ;;  %v1057_v8 = vpop.eup %1056 }
  0x87   : > { %674 = vperm.xlu0 %928, %v1053_v6  }
  0x89   : > { %689 = vperm.xlu1 %929, %v1055_v7   ;;  %v520_v7 = vld [vmem:[%s1352_s19 + $0xa0] sm:$0xff] }
  0x8b   : > { %684 = vperm.xlu0 %928, %v1057_v8  }
  0xcc   : > { %v545_v11 = vpop.permute.xlu1 %544 }
  0xcd   : > { %v694_v12 = vmul.f32 %v545_v11, %v502_v9  ;;  %v535_v13 = vpop.permute.xlu0 %534 }
  0xce   : > { %v692_v14 = vmul.f32 %v535_v13, %v500_v10  ;;  %v523_v10 = vld [vmem:[%s1352_s19 + $0xb8] sm:$0xff]  ;;  %v522_v13 = vld [vmem:[%s1352_s19 + $0xb0] sm:$0xff] }
  0xcf   : > { %727 = vst.msk [vmem:[%s1359_s24 + $0x10] sm:$0xff] %vm724_vm0, %v694_v12 }
  0xd0   : > { %725 = vst.msk [vmem:[%s1359_s24] sm:$0xff] %vm724_vm0, %v692_v14  ;;  %v550_v17 = vpop.permute.xlu1 %549 }
  0xd1   : > { %v695_v18 = vmul.f32 %v550_v17, %v503_v15  ;;  %v540_v19 = vpop.permute.xlu0 %539 }
  0xd2   : > { %v693_v20 = vmul.f32 %v540_v19, %v501_v16  ;;  %v525_v16 = vld [vmem:[%s1352_s19 + $0xc8] sm:$0xff]  ;;  %v524_v19 = vld [vmem:[%s1352_s19 + $0xc0] sm:$0xff] }
  0xd3   : > { %728 = vst.msk [vmem:[%s1359_s24 + $0x18] sm:$0xff] %vm724_vm0, %v695_v18 }
  0xd4   : > { %726 = vst.msk [vmem:[%s1359_s24 + $0x8] sm:$0xff] %vm724_vm0, %v693_v20  ;;  %v560_v22 = vpop.permute.xlu1 %559 }
  0xd5   : > { %v697_v23 = vmul.f32 %v560_v22, %v505_v21  ;;  %v555_v24 = vpop.permute.xlu0 %554 }
  0xd6   : > { %v696_v25 = vmul.f32 %v555_v24, %v504_v1  ;;  %v527_v1 = vld [vmem:[%s1352_s19 + $0xd8] sm:$0xff]  ;;  %v526_v24 = vld [vmem:[%s1352_s19 + $0xd0] sm:$0xff] }
  0xd7   : > { %730 = vst.msk [vmem:[%s1359_s24 + $0x28] sm:$0xff] %vm724_vm0, %v697_v23 }
  0xd8   : > { %729 = vst.msk [vmem:[%s1359_s24 + $0x20] sm:$0xff] %vm724_vm0, %v696_v25  ;;  %v570_v28 = vpop.permute.xlu1 %569 }
  0xd9   : > { %v699_v29 = vmul.f32 %v570_v28, %v507_v26  ;;  %v565_v31 = vpop.permute.xlu0 %564 }
  0xda   : > { %v698_v32 = vmul.f32 %v565_v31, %v506_v27  ;;  %v529_v27 = vld [vmem:[%s1352_s19 + $0xe8] sm:$0xff]  ;;  %v528_v31 = vld [vmem:[%s1352_s19 + $0xe0] sm:$0xff] }
  0xdb   : > { %732 = vst.msk [vmem:[%s1359_s24 + $0x38] sm:$0xff] %vm724_vm0, %v699_v29 }
  0xdc   : > { %731 = vst.msk [vmem:[%s1359_s24 + $0x30] sm:$0xff] %vm724_vm0, %v698_v32  ;;  %v580_v34 = vpop.permute.xlu1 %579 }
  0xdd   : > { %v701_v35 = vmul.f32 %v580_v34, %v509_v30  ;;  %v575_v3 = vpop.permute.xlu0 %574 }
  0xde   : > { %v700_v36 = vmul.f32 %v575_v3, %v508_v33  ;;  %v531_v33 = vld [vmem:[%s1352_s19 + $0xf8] sm:$0xff]  ;;  %v530_v3 = vld [vmem:[%s1352_s19 + $0xf0] sm:$0xff] }
  0xdf   : > { %734 = vst.msk [vmem:[%s1359_s24 + $0x48] sm:$0xff] %vm724_vm0, %v701_v35 }
  0xe0   : > { %733 = vst.msk [vmem:[%s1359_s24 + $0x40] sm:$0xff] %vm724_vm0, %v700_v36  ;;  %v590_v39 = vpop.permute.xlu1 %589 }
  0xe1   : > { %v703_v40 = vmul.f32 %v590_v39, %v511_v37  ;;  %v585_v41 = vpop.permute.xlu0 %584 }
  0xe2   : > { %v702_v42 = vmul.f32 %v585_v41, %v510_v38 }
  0xe3   : > { %736 = vst.msk [vmem:[%s1359_s24 + $0x58] sm:$0xff] %vm724_vm0, %v703_v40 }
  0xe4   : > { %735 = vst.msk [vmem:[%s1359_s24 + $0x50] sm:$0xff] %vm724_vm0, %v702_v42  ;;  %v600_v44 = vpop.permute.xlu1 %599 }
  0xe5   : > { %v705_v46 = vmul.f32 %v600_v44, %v513_v43 }
  0xe6   : > { %v595_v47 = vpop.permute.xlu0 %594 }
  0xe7   : > { %738 = vst.msk [vmem:[%s1359_s24 + $0x68] sm:$0xff] %vm724_vm0, %v705_v46  ;;  %v704_v49 = vmul.f32 %v595_v47, %v512_v45 }
  0xe8   : > { %v610_v50 = vpop.permute.xlu1 %609 }
  0xe9   : > { %737 = vst.msk [vmem:[%s1359_s24 + $0x60] sm:$0xff] %vm724_vm0, %v704_v49  ;;  %v707_v52 = vmul.f32 %v610_v50, %v515_v48 }
  0xea   : > { %v605_v53 = vpop.permute.xlu0 %604 }
  0xeb   : > { %740 = vst.msk [vmem:[%s1359_s24 + $0x78] sm:$0xff] %vm724_vm0, %v707_v52  ;;  %v706_v55 = vmul.f32 %v605_v53, %v514_v51 }
  0xec   : > { %v620_v56 = vpop.permute.xlu1 %619 }
  0xed   : > { %739 = vst.msk [vmem:[%s1359_s24 + $0x70] sm:$0xff] %vm724_vm0, %v706_v55  ;;  %v709_v58 = vmul.f32 %v620_v56, %v517_v54 }
  0xee   : > { %v615_v59 = vpop.permute.xlu0 %614 }
  0xef   : > { %742 = vst.msk [vmem:[%s1359_s24 + $0x88] sm:$0xff] %vm724_vm0, %v709_v58  ;;  %v708_v61 = vmul.f32 %v615_v59, %v516_v57 }
  0xf0   : > { %v630_v62 = vpop.permute.xlu1 %629 }
  0xf1   : > { %741 = vst.msk [vmem:[%s1359_s24 + $0x80] sm:$0xff] %vm724_vm0, %v708_v61  ;;  %v711_v0 = vmul.f32 %v630_v62, %v519_v60 }
  0xf2   : > { %v625_v2 = vpop.permute.xlu0 %624 }
  0xf3   : > { %744 = vst.msk [vmem:[%s1359_s24 + $0x98] sm:$0xff] %vm724_vm0, %v711_v0  ;;  %v710_v5 = vmul.f32 %v625_v2, %v518_v63 }
  0xf4   : > { %v640_v6 = vpop.permute.xlu1 %639 }
  0xf5   : > { %743 = vst.msk [vmem:[%s1359_s24 + $0x90] sm:$0xff] %vm724_vm0, %v710_v5  ;;  %v713_v8 = vmul.f32 %v640_v6, %v521_v4 }
  0xf6   : > { %v635_v9 = vpop.permute.xlu0 %634 }
  0xf7   : > { %746 = vst.msk [vmem:[%s1359_s24 + $0xa8] sm:$0xff] %vm724_vm0, %v713_v8  ;;  %v712_v11 = vmul.f32 %v635_v9, %v520_v7 }
  0xf8   : > { %v650_v12 = vpop.permute.xlu1 %649 }
  0xf9   : > { %745 = vst.msk [vmem:[%s1359_s24 + $0xa0] sm:$0xff] %vm724_vm0, %v712_v11  ;;  %v715_v14 = vmul.f32 %v650_v12, %v523_v10 }
  0xfa   : > { %v645_v15 = vpop.permute.xlu0 %644 }
  0xfb   : > { %748 = vst.msk [vmem:[%s1359_s24 + $0xb8] sm:$0xff] %vm724_vm0, %v715_v14  ;;  %v714_v17 = vmul.f32 %v645_v15, %v522_v13 }
  0xfc   : > { %v660_v18 = vpop.permute.xlu1 %659 }
  0xfd   : > { %747 = vst.msk [vmem:[%s1359_s24 + $0xb0] sm:$0xff] %vm724_vm0, %v714_v17  ;;  %v717_v20 = vmul.f32 %v660_v18, %v525_v16 }
  0xfe   : > { %v655_v21 = vpop.permute.xlu0 %654 }
  0xff   : > { %750 = vst.msk [vmem:[%s1359_s24 + $0xc8] sm:$0xff] %vm724_vm0, %v717_v20  ;;  %v716_v22 = vmul.f32 %v655_v21, %v524_v19 }
 0x100   : > { %v670_v23 = vpop.permute.xlu1 %669 }
 0x101   : > { %749 = vst.msk [vmem:[%s1359_s24 + $0xc0] sm:$0xff] %vm724_vm0, %v716_v22  ;;  %v719_v25 = vmul.f32 %v670_v23, %v527_v1 }
 0x102   : > { %v665_v26 = vpop.permute.xlu0 %664 }
 0x103   : > { %752 = vst.msk [vmem:[%s1359_s24 + $0xd8] sm:$0xff] %vm724_vm0, %v719_v25  ;;  %v718_v28 = vmul.f32 %v665_v26, %v526_v24 }
 0x104   : > { %v680_v29 = vpop.permute.xlu1 %679 }
 0x105   : > { %751 = vst.msk [vmem:[%s1359_s24 + $0xd0] sm:$0xff] %vm724_vm0, %v718_v28  ;;  %v721_v32 = vmul.f32 %v680_v29, %v529_v27 }
 0x106   : > { %v675_v30 = vpop.permute.xlu0 %674 }
 0x107   : > { %754 = vst.msk [vmem:[%s1359_s24 + $0xe8] sm:$0xff] %vm724_vm0, %v721_v32  ;;  %v720_v34 = vmul.f32 %v675_v30, %v528_v31 }
 0x108   : > { %v690_v35 = vpop.permute.xlu1 %689 }
 0x109   : > { %753 = vst.msk [vmem:[%s1359_s24 + $0xe0] sm:$0xff] %vm724_vm0, %v720_v34  ;;  %v723_v36 = vmul.f32 %v690_v35, %v531_v33 }
 0x10a   : > { %v685_v37 = vpop.permute.xlu0 %684 }
 0x10b   : > { %756 = vst.msk [vmem:[%s1359_s24 + $0xf8] sm:$0xff] %vm724_vm0, %v723_v36  ;;  %v722_v38 = vmul.f32 %v685_v37, %v530_v3 }
 0x10d   : > { %755 = vst.msk [vmem:[%s1359_s24 + $0xf0] sm:$0xff] %vm724_vm0, %v722_v38 }
 0x10e   : > { %1086 = shalt.err (!%p1083_p2)
}
 0x10f   : > { %s1087_s7 = scalar_lea.hbm %s1455_s29, 4096  ;;  %s1091_s10 = scalar_lea.hbm %s1509_s3, 8192 }
 0x110   : > { %p1088_p3 = scmp.ne.s32.totalorder %s1455_s29, %s1087_s7  ;;  %p1092_p8 = scmp.lt.u32.totalorder %s1455_s29, %s1509_s3 }
 0x111   : > { %p1093_p11 = scmp.lt.u32.totalorder %s1091_s10, %s1087_s7  ;;  %p1095_p10 = scmp.lt.u32.totalorder %s1087_s7, %s1455_s29 }
 0x112   : > { %p1089_p4 = pnand %p1088_p3, %p1204_p5 }
 0x113   : > { %p1094_p9 = por %p1093_p11, %p1092_p8 }
 0x114   : > { %p1090_p7 = pneg %p1089_p4 }
 0x115   : > { %p1096_p12 = por %p1095_p10, %p1094_p9 }
 0x117   : > { %p1097_p13 = pnand %p1096_p12, %p1090_p7 }
 0x119   : > { %1100 = shalt.err (!%p1097_p13)
}
 0x11a   : > { %s1144_s19 = smov 128   ;;  %s1145_s20 = smov 8  }
 0x11b   : > { %879 = dma.vmem_to_hbm [thread:$0]  (%p1204_p5), %s1457_s26, 4096, %s1455_s29, %s1465_s16, %s1144_s19, %s1144_s19, %s1145_s20  }
 0x11c PF: > { %p891_p0 = scmp.ge.s32.totalorder %s1139_s15, 2  ;;  %s786_s24 = sand.u32 1, %s1127_s12  }
 0x11d   : > { %s787_s25 = scalar_lea.sflag [#allocation3], %s786_s24 }
 0x11e   : > { %p886_p1 = pnand %p891_p0, %p1208_p6 }
 0x120   : > { %1122 = dma.done.wait (!%p886_p1), %s787_s25, 4096  }
 0x121   : > { %1124 = vsyncadd (!%p886_p1), %s787_s25, 4294963200  ;;  %p14_p2 = scmp.ge.s32.totalorder %s1191_s18, 4   ;;  %s1513_s12 = smov %s1131_s13 }
 0x122   : > { %s1514_s13 = smov %s1135_s14  ;;  %s1515_s14 = smov %s1202_s21 }
 0x123   : > { %s1516_s15 = smov %s1191_s18  ;;  %16 = sbr.rel (!%p14_p2) target bundleno = 4 (0x4), region = 75 }
 0x12a   :  { %792 = vsyncpa [#allocation3], 1 }
 0x12b   :  { %794 = vsyncpa [#allocation3 + $0x1], 1 }
 0x12c   :  { %795 = vsyncpa [#allocation4], 1 }
 0x12d   :  { %797 = vsyncpa [#allocation4 + $0x1], 1 }

// kernel: attention_block_forward.4
= control target key start
LH: loop header
LB: loop body
LE: loop exit
PB: predicated region body
PF: predicated region fallthrough
CT: control target
= control target key end

     0   :  { %s827_s18 = smov 0   ;;  %s1203_s0 = inlined_call_operand.vmem [shape: f32[512,16], index: 0, kind: input, shape index: {}]   ;;  %s1204_s1 = inlined_call_operand.vmem [shape: f32[512,16], index: 1, kind: input, shape index: {}]   ;;  %s1205_s2 = inlined_call_operand.vmem [shape: f32[2,16], index: 2, kind: input, shape index: {}]   ;;  %s1206_s3 = inlined_call_operand.vmem [shape: f32[2,16], index: 3, kind: input, shape index: {}]   ;;  %s1207_s4 = inlined_call_operand.vmem [shape: f32[1,16], index: 4, kind: input, shape index: {}]   ;;  %s1208_s5 = inlined_call_operand.vmem [shape: f32[512,1], index: 5, kind: output, shape index: {}]  }
   0x1 LB: > { %s763_s19 = sadd.s32 4294967295, %s795_s18   ;;  %p767_p0 = scmp.ge.s32.totalorder %s795_s18, 1  ;;  %s795_s18 = sphi %s827_s18, %s15_s18  }
   0x2   : > { %p199_p1 = scmp.lt.s32.totalorder %s795_s18, 3 }
   0x4   : > { %p200_p2 = pnand %p767_p0, %p199_p1 }
   0x5   : > { %s768_s20 = sshll.u32 (!%p200_p2), %s763_s19, 5  ;;  %v840_v0 = vld [vmem:[%s1205_s2] ss:$0 sm:$0xff] (!%p200_p2)  ;;  %v862_v2 = vld [vmem:[%s1205_s2 + $0x1] ss:$0 sm:$0xff] (!%p200_p2)  ;;  %vm565_vm0 = vcmask (!%p200_p2), 130048  }
   0x6   : > { %203 = sbr.rel (%p200_p2) target bundleno = 232 (0xe8), region = 40  ;;  %p233_p3 = scmp.lt.s32.totalorder (!%p200_p2), %s768_s20, 63  ;;  %v845_v1 = vld [vmem:[%s1206_s3] ss:$0 sm:$0xff] (!%p200_p2)  ;;  %v867_v3 = vld [vmem:[%s1206_s3 + $0x1] ss:$0 sm:$0xff] (!%p200_p2) }
   0x7   : > { %v901_v34 = vld [vmem:[%s1207_s4] ss:$0 sm:$0xff] (!%p200_p2)  ;;  %vm662_vm1 = vcmask (!%p200_p2), 7168  }
   0xd   : > { %s1210_s20 = smov (!%p233_p3, %s768_s20), 63 }
   0xe   : > { %s835_s21 = sshll.u32 %s1210_s20, 3 }
   0xf   : > { %s851_s28 = scalar_lea.vmem %s1203_s0, %s835_s21  ;;  %s857_s6 = scalar_lea.vmem %s1204_s1, %s835_s21 }
  0x10   : > { %v252_v4 = vld [vmem:[%s851_s28 + $0x10] sm:$0xff]  ;;  %v250_v6 = vld [vmem:[%s851_s28] sm:$0xff]  ;;  %v253_v11 = vld [vmem:[%s851_s28 + $0x18] sm:$0xff]  ;;  %s1134_s15 = scalar_lea.vmem %s1208_s5, %s835_s21 }
  0x11   : > { %v358_v5 = vld [vmem:[%s857_s6 + $0x10] sm:$0xff]  ;;  %v289_v7 = vmul.f32 %v840_v0, %v252_v4  ;;  %v287_v9 = vmul.f32 %v840_v0, %v250_v6  ;;  %v356_v10 = vld [vmem:[%s857_s6] sm:$0xff]  ;;  %v359_v12 = vld [vmem:[%s857_s6 + $0x18] sm:$0xff]  ;;  %v290_v14 = vmul.f32 %v840_v0, %v253_v11 }
  0x12   : > { %v395_v8 = vmul.f32 %v845_v1, %v358_v5  ;;  %v393_v13 = vmul.f32 %v845_v1, %v356_v10  ;;  %v396_v15 = vmul.f32 %v845_v1, %v359_v12  ;;  %v251_v16 = vld [vmem:[%s851_s28 + $0x8] sm:$0xff]  ;;  %v254_v24 = vld [vmem:[%s851_s28 + $0x20] sm:$0xff]  ;;  %v257_v39 = vld [vmem:[%s851_s28 + $0x38] sm:$0xff] }
  0x13   : > { %v357_v17 = vld [vmem:[%s857_s6 + $0x8] sm:$0xff]  ;;  %v326_v19 = vadd.f32 %v862_v2, %v289_v7  ;;  %v324_v21 = vadd.f32 %v862_v2, %v287_v9  ;;  %v288_v22 = vmul.f32 %v840_v0, %v251_v16  ;;  %v327_v26 = vadd.f32 %v862_v2, %v290_v14  ;;  %v360_v29 = vld [vmem:[%s857_s6 + $0x20] sm:$0xff]  ;;  %v363_v44 = vld [vmem:[%s857_s6 + $0x38] sm:$0xff] }
  0x14   : > { %v255_v18 = vld [vmem:[%s851_s28 + $0x28] sm:$0xff]  ;;  %v432_v20 = vadd.f32 %v867_v3, %v395_v8  ;;  %v430_v25 = vadd.f32 %v867_v3, %v393_v13  ;;  %v433_v27 = vadd.f32 %v867_v3, %v396_v15  ;;  %v394_v28 = vmul.f32 %v845_v1, %v357_v17  ;;  %v256_v57 = vld [vmem:[%s851_s28 + $0x30] sm:$0xff]  ;;  %v258_v13 = vld [vmem:[%s851_s28 + $0x40] sm:$0xff] }
  0x15   : > { %v361_v23 = vld [vmem:[%s857_s6 + $0x28] sm:$0xff]  ;;  %v325_v31 = vadd.f32 %v862_v2, %v288_v22  ;;  %v292_v32 = vmul.f32 %v840_v0, %v255_v18  ;;  %v291_v38 = vmul.f32 %v840_v0, %v254_v24  ;;  %v397_v43 = vmul.f32 %v845_v1, %v360_v29  ;;  %v362_v58 = vld [vmem:[%s857_s6 + $0x30] sm:$0xff]  ;;  %v364_v18 = vld [vmem:[%s857_s6 + $0x40] sm:$0xff] }
  0x16   : > { %v464_v30 = vadd.f32 %v432_v20, %v326_v19  ;;  %v398_v33 = vmul.f32 %v845_v1, %v361_v23  ;;  %v462_v35 = vadd.f32 %v430_v25, %v324_v21  ;;  %v465_v36 = vadd.f32 %v433_v27, %v327_v26  ;;  %v259_v63 = vld [vmem:[%s851_s28 + $0x48] sm:$0xff]  ;;  %v261_v19 = vld [vmem:[%s851_s28 + $0x58] sm:$0xff]  ;;  %v260_v29 = vld [vmem:[%s851_s28 + $0x50] sm:$0xff] }
  0x17   : > { %v431_v37 = vadd.f32 %v867_v3, %v394_v28  ;;  %v329_v41 = vadd.f32 %v862_v2, %v292_v32  ;;  %v328_v48 = vadd.f32 %v862_v2, %v291_v38  ;;  %v434_v51 = vadd.f32 %v867_v3, %v397_v43  ;;  %v365_v4 = vld [vmem:[%s857_s6 + $0x48] sm:$0xff]  ;;  %v367_v24 = vld [vmem:[%s857_s6 + $0x58] sm:$0xff] }
  0x18   : > { %v496_v40 = vmax.f32 %v464_v30, 0.0  ;;  %v435_v42 = vadd.f32 %v867_v3, %v398_v33  ;;  %v494_v45 = vmax.f32 %v462_v35, 0.0  ;;  %v497_v46 = vmax.f32 %v465_v36, 0.0  ;;  %v366_v35 = vld [vmem:[%s857_s6 + $0x50] sm:$0xff] }
  0x19   : > { %v463_v47 = vadd.f32 %v431_v37, %v325_v31  ;;  %v294_v52 = vmul.f32 %v840_v0, %v257_v39  ;;  %v400_v56 = vmul.f32 %v845_v1, %v363_v44  ;;  %v466_v61 = vadd.f32 %v434_v51, %v328_v48 }
  0x1a   : > { %v535_v49 = vmul.f32 %v901_v34, %v496_v40  ;;  %v467_v50 = vadd.f32 %v435_v42, %v329_v41  ;;  %v533_v53 = vmul.f32 %v901_v34, %v494_v45  ;;  %v536_v54 = vmul.f32 %v901_v34, %v497_v46  ;;  %v263_v40 = vld [vmem:[%s851_s28 + $0x68] sm:$0xff] }
  0x1b   : > { %v495_v55 = vmax.f32 %v463_v47, 0.0  ;;  %v331_v62 = vadd.f32 %v862_v2, %v294_v52  ;;  %v437_v8 = vadd.f32 %v867_v3, %v400_v56  ;;  %v498_v10 = vmax.f32 %v466_v61, 0.0  ;;  %v369_v45 = vld [vmem:[%s857_s6 + $0x68] sm:$0xff] }
  0x1c   : > { %v572_v59 = vsel %vm565_vm0, %v535_v49, 0.0  ;;  %v499_v60 = vmax.f32 %v467_v50, 0.0  ;;  %v566_v5 = vsel %vm565_vm0, %v533_v53, 0.0  ;;  %v575_v6 = vsel %vm565_vm0, %v536_v54, 0.0  ;;  %v262_v50 = vld [vmem:[%s851_s28 + $0x60] sm:$0xff] }
  0x1d   : > { %573 = vadd.xlane.f32.xlu1 %v572_v59  ;;  %v534_v7 = vmul.f32 %v901_v34, %v495_v55  ;;  %567 = vadd.xlane.f32.xlu0 %v566_v5  ;;  %v293_v11 = vmul.f32 %v840_v0, %v256_v57  ;;  %v399_v12 = vmul.f32 %v845_v1, %v362_v58  ;;  %v368_v59 = vld [vmem:[%s857_s6 + $0x60] sm:$0xff]  ;;  %v371_v5 = vld [vmem:[%s857_s6 + $0x78] sm:$0xff] }
  0x1e   : > { %v538_v9 = vmul.f32 %v901_v34, %v499_v60  ;;  %v469_v15 = vadd.f32 %v437_v8, %v331_v62  ;;  %v296_v16 = vmul.f32 %v840_v0, %v259_v63  ;;  %v402_v17 = vmul.f32 %v845_v1, %v365_v4  ;;  %v265_v60 = vld [vmem:[%s851_s28 + $0x78] sm:$0xff] }
  0x1f   : > { %v569_v14 = vsel %vm565_vm0, %v534_v7, 0.0  ;;  %v537_v21 = vmul.f32 %v901_v34, %v498_v10  ;;  %v330_v22 = vadd.f32 %v862_v2, %v293_v11  ;;  %v436_v23 = vadd.f32 %v867_v3, %v399_v12  ;;  %v264_v10 = vld [vmem:[%s851_s28 + $0x70] sm:$0xff] }
  0x20   : > { %v581_v20 = vsel %vm565_vm0, %v538_v9, 0.0  ;;  %v501_v25 = vmax.f32 %v469_v15, 0.0  ;;  %v333_v26 = vadd.f32 %v862_v2, %v296_v16  ;;  %v439_v27 = vadd.f32 %v867_v3, %v402_v17 }
  0x21   : > { %576 = vadd.xlane.f32.xlu1 %v575_v6  ;;  %v295_v28 = vmul.f32 %v840_v0, %v258_v13  ;;  %570 = vadd.xlane.f32.xlu0 %v569_v14  ;;  %v578_v30 = vsel %vm565_vm0, %v537_v21, 0.0  ;;  %v468_v31 = vadd.f32 %v436_v23, %v330_v22  ;;  %v401_v32 = vmul.f32 %v845_v1, %v364_v18 }
  0x22   : > { %v298_v33 = vmul.f32 %v840_v0, %v261_v19  ;;  %v540_v36 = vmul.f32 %v901_v34, %v501_v25  ;;  %v471_v37 = vadd.f32 %v439_v27, %v333_v26  ;;  %v404_v39 = vmul.f32 %v845_v1, %v367_v24  ;;  %v370_v19 = vld [vmem:[%s857_s6 + $0x70] sm:$0xff]  ;;  %v373_v25 = vld [vmem:[%s857_s6 + $0x88] sm:$0xff] }
  0x23   : > { %v332_v38 = vadd.f32 %v862_v2, %v295_v28  ;;  %v500_v41 = vmax.f32 %v468_v31, 0.0  ;;  %v438_v42 = vadd.f32 %v867_v3, %v401_v32  ;;  %v297_v44 = vmul.f32 %v840_v0, %v260_v29 }
  0x24   : > { %v335_v43 = vadd.f32 %v862_v2, %v298_v33  ;;  %v587_v46 = vsel %vm565_vm0, %v540_v36, 0.0  ;;  %v503_v47 = vmax.f32 %v471_v37, 0.0  ;;  %v441_v48 = vadd.f32 %v867_v3, %v404_v39  ;;  %v372_v36 = vld [vmem:[%s857_s6 + $0x80] sm:$0xff] }
  0x25   : > { %582 = vadd.xlane.f32.xlu1 %v581_v20  ;;  %v403_v49 = vmul.f32 %v845_v1, %v366_v35  ;;  %579 = vadd.xlane.f32.xlu0 %v578_v30  ;;  %v539_v51 = vmul.f32 %v901_v34, %v500_v41  ;;  %v470_v52 = vadd.f32 %v438_v42, %v332_v38  ;;  %v267_v20 = vld [vmem:[%s851_s28 + $0x88] sm:$0xff]  ;;  %v266_v30 = vld [vmem:[%s851_s28 + $0x80] sm:$0xff]  ;;  %v269_v41 = vld [vmem:[%s851_s28 + $0x98] sm:$0xff] }
  0x26   : > { %v334_v53 = vadd.f32 %v862_v2, %v297_v44  ;;  %v300_v54 = vmul.f32 %v840_v0, %v263_v40  ;;  %v542_v55 = vmul.f32 %v901_v34, %v503_v47  ;;  %v473_v56 = vadd.f32 %v441_v48, %v335_v43 }
  0x27   : > { %v440_v57 = vadd.f32 %v867_v3, %v403_v49  ;;  %v406_v58 = vmul.f32 %v845_v1, %v369_v45  ;;  %v584_v61 = vsel %vm565_vm0, %v539_v51, 0.0  ;;  %v502_v62 = vmax.f32 %v470_v52, 0.0  ;;  %v268_v51 = vld [vmem:[%s851_s28 + $0x90] sm:$0xff] }
  0x28   : > { %v337_v63 = vadd.f32 %v862_v2, %v300_v54  ;;  %v299_v4 = vmul.f32 %v840_v0, %v262_v50  ;;  %v593_v6 = vsel %vm565_vm0, %v542_v55, 0.0  ;;  %v505_v7 = vmax.f32 %v473_v56, 0.0 }
  0x29   : > { %588 = vadd.xlane.f32.xlu1 %v587_v46  ;;  %v472_v8 = vadd.f32 %v440_v57, %v334_v53  ;;  %v443_v9 = vadd.f32 %v867_v3, %v406_v58  ;;  %585 = vadd.xlane.f32.xlu0 %v584_v61  ;;  %v541_v11 = vmul.f32 %v901_v34, %v502_v62  ;;  %v375_v46 = vld [vmem:[%s857_s6 + $0x98] sm:$0xff]  ;;  %v271_v61 = vld [vmem:[%s851_s28 + $0xa8] sm:$0xff] }
  0x2a   : > { %v336_v12 = vadd.f32 %v862_v2, %v299_v4  ;;  %v405_v13 = vmul.f32 %v845_v1, %v368_v59  ;;  %v302_v14 = vmul.f32 %v840_v0, %v265_v60  ;;  %v544_v15 = vmul.f32 %v901_v34, %v505_v7  ;;  %v374_v60 = vld [vmem:[%s857_s6 + $0x90] sm:$0xff] }
  0x2b   : > { %v504_v16 = vmax.f32 %v472_v8, 0.0  ;;  %v475_v17 = vadd.f32 %v443_v9, %v337_v63  ;;  %v408_v18 = vmul.f32 %v845_v1, %v371_v5  ;;  %v590_v21 = vsel %vm565_vm0, %v541_v11, 0.0  ;;  %v270_v11 = vld [vmem:[%s851_s28 + $0xa0] sm:$0xff] }
  0x2c   : > { %v442_v22 = vadd.f32 %v867_v3, %v405_v13  ;;  %v339_v23 = vadd.f32 %v862_v2, %v302_v14  ;;  %v301_v24 = vmul.f32 %v840_v0, %v264_v10  ;;  %v599_v26 = vsel %vm565_vm0, %v544_v15, 0.0 }
  0x2d   : > { %594 = vadd.xlane.f32.xlu1 %v593_v6  ;;  %v543_v27 = vmul.f32 %v901_v34, %v504_v16  ;;  %v507_v28 = vmax.f32 %v475_v17, 0.0  ;;  %v445_v29 = vadd.f32 %v867_v3, %v408_v18  ;;  %591 = vadd.xlane.f32.xlu0 %v590_v21  ;;  %v407_v33 = vmul.f32 %v845_v1, %v370_v19  ;;  %v377_v6 = vld [vmem:[%s857_s6 + $0xa8] sm:$0xff]  ;;  %v273_v21 = vld [vmem:[%s851_s28 + $0xb8] sm:$0xff] }
  0x2e   : > { %v474_v31 = vadd.f32 %v442_v22, %v336_v12  ;;  %v338_v32 = vadd.f32 %v862_v2, %v301_v24  ;;  %v304_v35 = vmul.f32 %v840_v0, %v267_v20  ;;  %v410_v40 = vmul.f32 %v845_v1, %v373_v25  ;;  %v376_v20 = vld [vmem:[%s857_s6 + $0xa0] sm:$0xff] }
  0x2f   : > { %v596_v37 = vsel %vm565_vm0, %v543_v27, 0.0  ;;  %v546_v38 = vmul.f32 %v901_v34, %v507_v28  ;;  %v477_v39 = vadd.f32 %v445_v29, %v339_v23  ;;  %v444_v43 = vadd.f32 %v867_v3, %v407_v33 }
  0x30   : > { %v506_v42 = vmax.f32 %v474_v31, 0.0  ;;  %v341_v44 = vadd.f32 %v862_v2, %v304_v35  ;;  %v303_v45 = vmul.f32 %v840_v0, %v266_v30  ;;  %v447_v49 = vadd.f32 %v867_v3, %v410_v40  ;;  %v272_v31 = vld [vmem:[%s851_s28 + $0xb0] sm:$0xff] }
  0x31   : > { %600 = vadd.xlane.f32.xlu1 %v599_v26  ;;  %v605_v47 = vsel %vm565_vm0, %v546_v38, 0.0  ;;  %v509_v48 = vmax.f32 %v477_v39, 0.0  ;;  %v409_v50 = vmul.f32 %v845_v1, %v372_v36  ;;  %597 = vadd.xlane.f32.xlu0 %v596_v37  ;;  %v476_v53 = vadd.f32 %v444_v43, %v338_v32  ;;  %v379_v26 = vld [vmem:[%s857_s6 + $0xb8] sm:$0xff]  ;;  %v378_v37 = vld [vmem:[%s857_s6 + $0xb0] sm:$0xff] }
  0x32   : > { %v545_v52 = vmul.f32 %v901_v34, %v506_v42  ;;  %v340_v54 = vadd.f32 %v862_v2, %v303_v45  ;;  %v306_v55 = vmul.f32 %v840_v0, %v269_v41  ;;  %v479_v57 = vadd.f32 %v447_v49, %v341_v44  ;;  %v275_v42 = vld [vmem:[%s851_s28 + $0xc8] sm:$0xff] }
  0x33   : > { %v548_v56 = vmul.f32 %v901_v34, %v509_v48  ;;  %v446_v58 = vadd.f32 %v867_v3, %v409_v50  ;;  %v412_v59 = vmul.f32 %v845_v1, %v375_v46  ;;  %v508_v63 = vmax.f32 %v476_v53, 0.0 }
  0x34   : > { %v602_v62 = vsel %vm565_vm0, %v545_v52, 0.0  ;;  %v343_v4 = vadd.f32 %v862_v2, %v306_v55  ;;  %v305_v5 = vmul.f32 %v840_v0, %v268_v51  ;;  %v511_v8 = vmax.f32 %v479_v57, 0.0  ;;  %v274_v52 = vld [vmem:[%s851_s28 + $0xc0] sm:$0xff] }
  0x35   : > { %606 = vadd.xlane.f32.xlu1 %v605_v47  ;;  %v611_v7 = vsel %vm565_vm0, %v548_v56, 0.0  ;;  %v478_v9 = vadd.f32 %v446_v58, %v340_v54  ;;  %v449_v10 = vadd.f32 %v867_v3, %v412_v59  ;;  %603 = vadd.xlane.f32.xlu0 %v602_v62  ;;  %v547_v12 = vmul.f32 %v901_v34, %v508_v63  ;;  %v381_v47 = vld [vmem:[%s857_s6 + $0xc8] sm:$0xff]  ;;  %v277_v62 = vld [vmem:[%s851_s28 + $0xd8] sm:$0xff] }
  0x36   : > { %v342_v13 = vadd.f32 %v862_v2, %v305_v5  ;;  %v411_v14 = vmul.f32 %v845_v1, %v374_v60  ;;  %v308_v15 = vmul.f32 %v840_v0, %v271_v61  ;;  %v550_v16 = vmul.f32 %v901_v34, %v511_v8  ;;  %v380_v61 = vld [vmem:[%s857_s6 + $0xc0] sm:$0xff] }
  0x37   : > { %v510_v17 = vmax.f32 %v478_v9, 0.0  ;;  %v481_v18 = vadd.f32 %v449_v10, %v343_v4  ;;  %v414_v19 = vmul.f32 %v845_v1, %v377_v6  ;;  %v608_v22 = vsel %vm565_vm0, %v547_v12, 0.0  ;;  %v276_v12 = vld [vmem:[%s851_s28 + $0xd0] sm:$0xff] }
  0x38   : > { %v448_v23 = vadd.f32 %v867_v3, %v411_v14  ;;  %v345_v24 = vadd.f32 %v862_v2, %v308_v15  ;;  %v307_v25 = vmul.f32 %v840_v0, %v270_v11  ;;  %v617_v27 = vsel %vm565_vm0, %v550_v16, 0.0 }
  0x39   : > { %612 = vadd.xlane.f32.xlu1 %v611_v7  ;;  %v549_v28 = vmul.f32 %v901_v34, %v510_v17  ;;  %v513_v29 = vmax.f32 %v481_v18, 0.0  ;;  %v451_v30 = vadd.f32 %v867_v3, %v414_v19  ;;  %609 = vadd.xlane.f32.xlu0 %v608_v22  ;;  %v413_v35 = vmul.f32 %v845_v1, %v376_v20  ;;  %v383_v7 = vld [vmem:[%s857_s6 + $0xd8] sm:$0xff]  ;;  %v279_v22 = vld [vmem:[%s851_s28 + $0xe8] sm:$0xff] }
  0x3a   : > { %v480_v32 = vadd.f32 %v448_v23, %v342_v13  ;;  %v344_v33 = vadd.f32 %v862_v2, %v307_v25  ;;  %v310_v36 = vmul.f32 %v840_v0, %v273_v21  ;;  %v416_v41 = vmul.f32 %v845_v1, %v379_v26  ;;  %v382_v21 = vld [vmem:[%s857_s6 + $0xd0] sm:$0xff] }
  0x3b   : > { %v614_v38 = vsel %vm565_vm0, %v549_v28, 0.0  ;;  %v552_v39 = vmul.f32 %v901_v34, %v513_v29  ;;  %v483_v40 = vadd.f32 %v451_v30, %v345_v24  ;;  %v450_v44 = vadd.f32 %v867_v3, %v413_v35 }
  0x3c   : > { %v512_v43 = vmax.f32 %v480_v32, 0.0  ;;  %v347_v45 = vadd.f32 %v862_v2, %v310_v36  ;;  %v309_v46 = vmul.f32 %v840_v0, %v272_v31  ;;  %v453_v50 = vadd.f32 %v867_v3, %v416_v41  ;;  %v278_v32 = vld [vmem:[%s851_s28 + $0xe0] sm:$0xff] }
  0x3d   : > { %618 = vadd.xlane.f32.xlu1 %v617_v27  ;;  %v623_v48 = vsel %vm565_vm0, %v552_v39, 0.0  ;;  %v515_v49 = vmax.f32 %v483_v40, 0.0  ;;  %v415_v51 = vmul.f32 %v845_v1, %v378_v37  ;;  %615 = vadd.xlane.f32.xlu0 %v614_v38  ;;  %v482_v54 = vadd.f32 %v450_v44, %v344_v33  ;;  %v385_v27 = vld [vmem:[%s857_s6 + $0xe8] sm:$0xff]  ;;  %v384_v38 = vld [vmem:[%s857_s6 + $0xe0] sm:$0xff] }
  0x3e   : > { %v551_v53 = vmul.f32 %v901_v34, %v512_v43  ;;  %v346_v55 = vadd.f32 %v862_v2, %v309_v46  ;;  %v312_v56 = vmul.f32 %v840_v0, %v275_v42  ;;  %v485_v58 = vadd.f32 %v453_v50, %v347_v45  ;;  %v281_v43 = vld [vmem:[%s851_s28 + $0xf8] sm:$0xff] }
  0x3f   : > { %v554_v57 = vmul.f32 %v901_v34, %v515_v49  ;;  %v452_v59 = vadd.f32 %v867_v3, %v415_v51  ;;  %v418_v60 = vmul.f32 %v845_v1, %v381_v47  ;;  %v514_v4 = vmax.f32 %v482_v54, 0.0 }
  0x40   : > { %v620_v63 = vsel %vm565_vm0, %v551_v53, 0.0  ;;  %v349_v5 = vadd.f32 %v862_v2, %v312_v56  ;;  %v311_v6 = vmul.f32 %v840_v0, %v274_v52  ;;  %v517_v9 = vmax.f32 %v485_v58, 0.0  ;;  %v280_v53 = vld [vmem:[%s851_s28 + $0xf0] sm:$0xff] }
  0x41   : > { %624 = vadd.xlane.f32.xlu1 %v623_v48  ;;  %v629_v8 = vsel %vm565_vm0, %v554_v57, 0.0  ;;  %v484_v10 = vadd.f32 %v452_v59, %v346_v55  ;;  %v455_v11 = vadd.f32 %v867_v3, %v418_v60  ;;  %621 = vadd.xlane.f32.xlu0 %v620_v63  ;;  %v553_v13 = vmul.f32 %v901_v34, %v514_v4  ;;  %v387_v48 = vld [vmem:[%s857_s6 + $0xf8] sm:$0xff] }
  0x42   : > { %v348_v14 = vadd.f32 %v862_v2, %v311_v6  ;;  %v417_v15 = vmul.f32 %v845_v1, %v380_v61  ;;  %v314_v16 = vmul.f32 %v840_v0, %v277_v62  ;;  %v556_v17 = vmul.f32 %v901_v34, %v517_v9  ;;  %v386_v62 = vld [vmem:[%s857_s6 + $0xf0] sm:$0xff] }
  0x43   : > { %v516_v18 = vmax.f32 %v484_v10, 0.0  ;;  %v487_v19 = vadd.f32 %v455_v11, %v349_v5  ;;  %v420_v20 = vmul.f32 %v845_v1, %v383_v7  ;;  %v626_v23 = vsel %vm565_vm0, %v553_v13, 0.0 }
  0x44   : > { %v454_v24 = vadd.f32 %v867_v3, %v417_v15  ;;  %v351_v25 = vadd.f32 %v862_v2, %v314_v16  ;;  %v313_v26 = vmul.f32 %v840_v0, %v276_v12  ;;  %v635_v28 = vsel %vm565_vm0, %v556_v17, 0.0 }
  0x45   : > { %630 = vadd.xlane.f32.xlu1 %v629_v8  ;;  %v555_v29 = vmul.f32 %v901_v34, %v516_v18  ;;  %v519_v30 = vmax.f32 %v487_v19, 0.0  ;;  %v457_v31 = vadd.f32 %v867_v3, %v420_v20  ;;  %627 = vadd.xlane.f32.xlu0 %v626_v23  ;;  %v419_v36 = vmul.f32 %v845_v1, %v382_v21 }
  0x46   : > { %v486_v33 = vadd.f32 %v454_v24, %v348_v14  ;;  %v350_v35 = vadd.f32 %v862_v2, %v313_v26  ;;  %v316_v37 = vmul.f32 %v840_v0, %v279_v22  ;;  %v422_v42 = vmul.f32 %v845_v1, %v385_v27 }
  0x47   : > { %v632_v39 = vsel %vm565_vm0, %v555_v29, 0.0  ;;  %v558_v40 = vmul.f32 %v901_v34, %v519_v30  ;;  %v489_v41 = vadd.f32 %v457_v31, %v351_v25  ;;  %v456_v45 = vadd.f32 %v867_v3, %v419_v36 }
  0x48   : > { %v518_v44 = vmax.f32 %v486_v33, 0.0  ;;  %v353_v46 = vadd.f32 %v862_v2, %v316_v37  ;;  %v315_v47 = vmul.f32 %v840_v0, %v278_v32  ;;  %v459_v51 = vadd.f32 %v867_v3, %v422_v42 }
  0x49   : > { %636 = vadd.xlane.f32.xlu1 %v635_v28  ;;  %v641_v49 = vsel %vm565_vm0, %v558_v40, 0.0  ;;  %v521_v50 = vmax.f32 %v489_v41, 0.0  ;;  %v421_v52 = vmul.f32 %v845_v1, %v384_v38  ;;  %633 = vadd.xlane.f32.xlu0 %v632_v39  ;;  %v488_v55 = vadd.f32 %v456_v45, %v350_v35 }
  0x4a   : > { %v557_v54 = vmul.f32 %v901_v34, %v518_v44  ;;  %v352_v56 = vadd.f32 %v862_v2, %v315_v47  ;;  %v318_v57 = vmul.f32 %v840_v0, %v281_v43  ;;  %v491_v59 = vadd.f32 %v459_v51, %v353_v46 }
  0x4b   : > { %v560_v58 = vmul.f32 %v901_v34, %v521_v50  ;;  %v458_v60 = vadd.f32 %v867_v3, %v421_v52  ;;  %v424_v61 = vmul.f32 %v845_v1, %v387_v48  ;;  %v520_v4 = vmax.f32 %v488_v55, 0.0 }
  0x4c   : > { %v638_v63 = vsel %vm565_vm0, %v557_v54, 0.0  ;;  %v355_v5 = vadd.f32 %v862_v2, %v318_v57  ;;  %v317_v6 = vmul.f32 %v840_v0, %v280_v53  ;;  %v523_v7 = vmax.f32 %v491_v59, 0.0 }
  0x4d   : > { %642 = vadd.xlane.f32.xlu1 %v641_v49  ;;  %v490_v8 = vadd.f32 %v458_v60, %v352_v56  ;;  %v461_v9 = vadd.f32 %v867_v3, %v424_v61  ;;  %639 = vadd.xlane.f32.xlu0 %v638_v63  ;;  %v647_v10 = vsel %vm565_vm0, %v560_v58, 0.0  ;;  %v559_v11 = vmul.f32 %v901_v34, %v520_v4 }
  0x4e   : > { %v354_v12 = vadd.f32 %v862_v2, %v317_v6  ;;  %v423_v13 = vmul.f32 %v845_v1, %v386_v62  ;;  %v562_v14 = vmul.f32 %v901_v34, %v523_v7 }
  0x4f   : > { %v522_v15 = vmax.f32 %v490_v8, 0.0  ;;  %v493_v16 = vadd.f32 %v461_v9, %v355_v5  ;;  %v644_v0 = vsel %vm565_vm0, %v559_v11, 0.0 }
  0x50   : > { %v460_v17 = vadd.f32 %v867_v3, %v423_v13  ;;  %v653_v20 = vsel %vm565_vm0, %v562_v14, 0.0 }
  0x51   : > { %648 = vadd.xlane.f32.xlu1 %v647_v10  ;;  %v561_v18 = vmul.f32 %v901_v34, %v522_v15  ;;  %v525_v19 = vmax.f32 %v493_v16, 0.0  ;;  %645 = vadd.xlane.f32.xlu0 %v644_v0 }
  0x52   : > { %v492_v21 = vadd.f32 %v460_v17, %v354_v12 }
  0x53   : > { %v650_v2 = vsel %vm565_vm0, %v561_v18, 0.0  ;;  %v564_v1 = vmul.f32 %v901_v34, %v525_v19 }
  0x54   : > { %v524_v22 = vmax.f32 %v492_v21, 0.0 }
  0x55   : > { %654 = vadd.xlane.f32.xlu1 %v653_v20  ;;  %651 = vadd.xlane.f32.xlu0 %v650_v2  ;;  %v659_v23 = vsel %vm565_vm0, %v564_v1, 0.0 }
  0x56   : > { %v563_v3 = vmul.f32 %v901_v34, %v524_v22 }
  0x58   : > { %v656_v24 = vsel %vm565_vm0, %v563_v3, 0.0 }
  0x59   : > { %660 = vadd.xlane.f32.xlu1 %v659_v23  ;;  %657 = vadd.xlane.f32.xlu0 %v656_v24 }
  0xaa   : > { %v574_v25 = vpop.xlane.xlu1 %573  ;;  %v568_v34 = vpop.xlane.xlu0 %567 }
  0xab   : > { %665 = vst.msk [vmem:[%s1134_s15 + $0x10] sm:$0xff] %vm662_vm1, %v574_v25  ;;  %663 = vst.msk [vmem:[%s1134_s15] sm:$0xff] %vm662_vm1, %v568_v34 }
  0xae   : > { %v577_v26 = vpop.xlane.xlu1 %576  ;;  %v571_v27 = vpop.xlane.xlu0 %570 }
  0xaf   : > { %666 = vst.msk [vmem:[%s1134_s15 + $0x18] sm:$0xff] %vm662_vm1, %v577_v26  ;;  %664 = vst.msk [vmem:[%s1134_s15 + $0x8] sm:$0xff] %vm662_vm1, %v571_v27 }
  0xb2   : > { %v583_v28 = vpop.xlane.xlu1 %582  ;;  %v580_v29 = vpop.xlane.xlu0 %579 }
  0xb3   : > { %668 = vst.msk [vmem:[%s1134_s15 + $0x28] sm:$0xff] %vm662_vm1, %v583_v28  ;;  %667 = vst.msk [vmem:[%s1134_s15 + $0x20] sm:$0xff] %vm662_vm1, %v580_v29 }
  0xb6   : > { %v589_v30 = vpop.xlane.xlu1 %588  ;;  %v586_v31 = vpop.xlane.xlu0 %585 }
  0xb7   : > { %670 = vst.msk [vmem:[%s1134_s15 + $0x38] sm:$0xff] %vm662_vm1, %v589_v30  ;;  %669 = vst.msk [vmem:[%s1134_s15 + $0x30] sm:$0xff] %vm662_vm1, %v586_v31 }
  0xba   : > { %v595_v32 = vpop.xlane.xlu1 %594  ;;  %v592_v33 = vpop.xlane.xlu0 %591 }
  0xbb   : > { %672 = vst.msk [vmem:[%s1134_s15 + $0x48] sm:$0xff] %vm662_vm1, %v595_v32  ;;  %671 = vst.msk [vmem:[%s1134_s15 + $0x40] sm:$0xff] %vm662_vm1, %v592_v33 }
  0xbe   : > { %v601_v35 = vpop.xlane.xlu1 %600  ;;  %v598_v36 = vpop.xlane.xlu0 %597 }
  0xbf   : > { %674 = vst.msk [vmem:[%s1134_s15 + $0x58] sm:$0xff] %vm662_vm1, %v601_v35  ;;  %673 = vst.msk [vmem:[%s1134_s15 + $0x50] sm:$0xff] %vm662_vm1, %v598_v36 }
  0xc2   : > { %v607_v37 = vpop.xlane.xlu1 %606  ;;  %v604_v38 = vpop.xlane.xlu0 %603 }
  0xc3   : > { %676 = vst.msk [vmem:[%s1134_s15 + $0x68] sm:$0xff] %vm662_vm1, %v607_v37  ;;  %675 = vst.msk [vmem:[%s1134_s15 + $0x60] sm:$0xff] %vm662_vm1, %v604_v38 }
  0xc6   : > { %v613_v39 = vpop.xlane.xlu1 %612  ;;  %v610_v40 = vpop.xlane.xlu0 %609 }
  0xc7   : > { %678 = vst.msk [vmem:[%s1134_s15 + $0x78] sm:$0xff] %vm662_vm1, %v613_v39  ;;  %677 = vst.msk [vmem:[%s1134_s15 + $0x70] sm:$0xff] %vm662_vm1, %v610_v40 }
  0xca   : > { %v619_v41 = vpop.xlane.xlu1 %618  ;;  %v616_v42 = vpop.xlane.xlu0 %615 }
  0xcb   : > { %680 = vst.msk [vmem:[%s1134_s15 + $0x88] sm:$0xff] %vm662_vm1, %v619_v41  ;;  %679 = vst.msk [vmem:[%s1134_s15 + $0x80] sm:$0xff] %vm662_vm1, %v616_v42 }
  0xce   : > { %v625_v43 = vpop.xlane.xlu1 %624  ;;  %v622_v44 = vpop.xlane.xlu0 %621 }
  0xcf   : > { %682 = vst.msk [vmem:[%s1134_s15 + $0x98] sm:$0xff] %vm662_vm1, %v625_v43  ;;  %681 = vst.msk [vmem:[%s1134_s15 + $0x90] sm:$0xff] %vm662_vm1, %v622_v44 }
  0xd2   : > { %v631_v45 = vpop.xlane.xlu1 %630  ;;  %v628_v46 = vpop.xlane.xlu0 %627 }
  0xd3   : > { %684 = vst.msk [vmem:[%s1134_s15 + $0xa8] sm:$0xff] %vm662_vm1, %v631_v45  ;;  %683 = vst.msk [vmem:[%s1134_s15 + $0xa0] sm:$0xff] %vm662_vm1, %v628_v46 }
  0xd6   : > { %v637_v47 = vpop.xlane.xlu1 %636  ;;  %v634_v48 = vpop.xlane.xlu0 %633 }
  0xd7   : > { %686 = vst.msk [vmem:[%s1134_s15 + $0xb8] sm:$0xff] %vm662_vm1, %v637_v47  ;;  %685 = vst.msk [vmem:[%s1134_s15 + $0xb0] sm:$0xff] %vm662_vm1, %v634_v48 }
  0xda   : > { %v643_v49 = vpop.xlane.xlu1 %642  ;;  %v640_v50 = vpop.xlane.xlu0 %639 }
  0xdb   : > { %688 = vst.msk [vmem:[%s1134_s15 + $0xc8] sm:$0xff] %vm662_vm1, %v643_v49  ;;  %687 = vst.msk [vmem:[%s1134_s15 + $0xc0] sm:$0xff] %vm662_vm1, %v640_v50 }
  0xde   : > { %v649_v51 = vpop.xlane.xlu1 %648  ;;  %v646_v52 = vpop.xlane.xlu0 %645 }
  0xdf   : > { %690 = vst.msk [vmem:[%s1134_s15 + $0xd8] sm:$0xff] %vm662_vm1, %v649_v51  ;;  %689 = vst.msk [vmem:[%s1134_s15 + $0xd0] sm:$0xff] %vm662_vm1, %v646_v52 }
  0xe2   : > { %v655_v53 = vpop.xlane.xlu1 %654  ;;  %v652_v54 = vpop.xlane.xlu0 %651 }
  0xe3   : > { %692 = vst.msk [vmem:[%s1134_s15 + $0xe8] sm:$0xff] %vm662_vm1, %v655_v53  ;;  %691 = vst.msk [vmem:[%s1134_s15 + $0xe0] sm:$0xff] %vm662_vm1, %v652_v54 }
  0xe6   : > { %v661_v55 = vpop.xlane.xlu1 %660  ;;  %v658_v56 = vpop.xlane.xlu0 %657 }
  0xe7   : > { %694 = vst.msk [vmem:[%s1134_s15 + $0xf8] sm:$0xff] %vm662_vm1, %v661_v55  ;;  %693 = vst.msk [vmem:[%s1134_s15 + $0xf0] sm:$0xff] %vm662_vm1, %v658_v56 }
  0xe8 PF: > { %s15_s18 = sadd.s32 1, %s795_s18  }
  0xe9   : > { %p12_p4 = scmp.ge.s32.totalorder %s15_s18, 4  }
  0xeb   :  { %14 = sbr.rel (!%p12_p4) target bundleno = 1 (0x1), region = 73 }

// kernel: attention_block_forward.3
= control target key start
LH: loop header
LB: loop body
LE: loop exit
PB: predicated region body
PF: predicated region fallthrough
CT: control target
= control target key end

     0   :  { %s1802_s21 = smov 0   ;;  %s2363_s0 = inlined_call_operand.vmem [shape: bf16[512,32], index: 0, kind: input, shape index: {}]   ;;  %s2364_s1 = inlined_call_operand.vmem [shape: bf16[512,32], index: 1, kind: input, shape index: {}]   ;;  %s2365_s2 = inlined_call_operand.vmem [shape: bf16[32,16], index: 2, kind: input, shape index: {}]   ;;  %s2366_s3 = inlined_call_operand.vmem [shape: bf16[32,16], index: 3, kind: input, shape index: {}]   ;;  %s2367_s4 = inlined_call_operand.vmem [shape: f32[512,16], index: 4, kind: output, shape index: {0}]   ;;  %s2368_s5 = inlined_call_operand.vmem [shape: f32[512,16], index: 5, kind: output, shape index: {1}]   ;;  %s2369_s6 = inlined_call_operand.vmem [shape: f32[2,4,16], index: 6, kind: output, shape index: {2}]  }
   0x1 LB: > { %s1808_s22 = sadd.s32 4294967295, %s1765_s21   ;;  %p1527_p0 = scmp.ge.s32.totalorder %s1765_s21, 1  ;;  %s1765_s21 = sphi %s1802_s21, %s17_s21  }
   0x2   : > { %p229_p1 = scmp.lt.s32.totalorder %s1765_s21, 3 }
   0x4   : > { %p230_p2 = pnand %p1527_p0, %p229_p1 }
   0x5   : > { %v1723_v0 = vld [vmem:[%s2365_s2] sm:$0xff] (!%p230_p2)   ;;  %s1528_s25 = sshll.u32 (!%p230_p2), %s1808_s22, 5  ;;  %v1725_v2 = vld [vmem:[%s2365_s2 + $0x8] sm:$0xff] (!%p230_p2)   ;;  %vm430_vm0 = vcmask (!%p230_p2), 261120   ;;  %vm977_vm1 = vcmask (!%p230_p2), 130048   ;;  %p297_p4 = scmp.lt.s32.totalorder (!%p230_p2), %s1808_s22, 1 }
   0x6   : > { %233 = sbr.rel (%p230_p2) target bundleno = 327 (0x147), region = 36  ;;  %v1724_v1 = vld [vmem:[%s2366_s3] sm:$0xff] (!%p230_p2)   ;;  %p274_p3 = scmp.lt.s32.totalorder (!%p230_p2), %s1528_s25, 63  ;;  %1643 = vmatprep.subr.bf16.mxu0 (!%p230_p2), %v1723_v0  ;;  %v1726_v3 = vld [vmem:[%s2366_s3 + $0x8] sm:$0xff] (!%p230_p2)   ;;  %vm1382_vm2 = vcmask (!%p230_p2), 1040384   ;;  %vm1384_vm3 = vcmask (!%p230_p2), 1041408  }
   0x7   : > { %1679 = vmatprep.subr.bf16.mxu1 (!%p230_p2), %v1724_v1  ;;  %1644 = vmatpush3.bf16.msra.mxu0 (!%p230_p2), %v1723_v0  ;;  %vm1386_vm4 = vcmask (!%p230_p2), 1042432   ;;  %vm1388_vm5 = vcmask (!%p230_p2), 125952  }
   0x8   : > { %1680 = vmatpush3.bf16.msra.mxu1 (!%p230_p2), %v1724_v1  ;;  %1645 = vmatprep.subr.bf16.mxu0 (!%p230_p2), %v1725_v2 }
   0x9   : > { %1681 = vmatprep.subr.bf16.mxu1 (!%p230_p2), %v1726_v3 }
   0xb   : > { %1646 = vmatpush3.bf16.msra.mxu0 (!%p230_p2), %v1725_v2 }
   0xc   : > { %1682 = vmatpush3.bf16.msra.mxu1 (!%p230_p2), %v1726_v3 }
   0xd   : > { %s2371_s25 = smov (!%p274_p3, %s1528_s25), 63  ;;  %s2373_s22 = smov (!%p297_p4, %s1808_s22), 1 }
   0xe   : > { %s1529_s8 = sshll.u32 %s2371_s25, 2  ;;  %s1533_s15 = sshll.u32 %s2371_s25, 3 }
   0xf   : > { %s1831_s11 = scalar_lea.vmem %s2363_s0, %s1529_s8  ;;  %s1836_s14 = scalar_lea.vmem %s2364_s1, %s1529_s8 }
  0x10   : > { %v1727_v4 = vld [vmem:[%s1831_s11] sm:$0xff]   ;;  %v1729_v6 = vld [vmem:[%s1831_s11 + $0x8] sm:$0xff]   ;;  %v1731_v8 = vld [vmem:[%s1831_s11 + $0x10] sm:$0xff]   ;;  %s1906_s18 = scalar_lea.vmem %s2367_s4, %s1533_s15  ;;  %s1911_s23 = scalar_lea.vmem %s2368_s5, %s1533_s15 }
  0x11   : > { %v1728_v5 = vld [vmem:[%s1836_s14] sm:$0xff]   ;;  %1647 = vmatprep.mubr.msk.bf16.mxu0 %vm430_vm0, %v1727_v4  ;;  %v1730_v7 = vld [vmem:[%s1836_s14 + $0x8] sm:$0xff]   ;;  %v1732_v9 = vld [vmem:[%s1836_s14 + $0x10] sm:$0xff]   ;;  %s1536_s24 = sshll.u32 %s2373_s22, 2 }
  0x12   : > { %1683 = vmatprep.mubr.msk.bf16.mxu1 %vm430_vm0, %v1728_v5  ;;  %1648 = vmatmul.mubr.msk.bf16.vlgmr.msra.gmra.mrb[0].mxu0 %vm430_vm0, %v1729_v6  ;;  %v1733_v10 = vld [vmem:[%s1831_s11 + $0x18] sm:$0xff]   ;;  %v1735_v12 = vld [vmem:[%s1831_s11 + $0x20] sm:$0xff]   ;;  %v1737_v14 = vld [vmem:[%s1831_s11 + $0x28] sm:$0xff]   ;;  %s300_s27 = scalar_lea.vmem %s2369_s6, %s1536_s24 }
  0x13   : > { %1684 = vmatmul.mubr.msk.bf16.vlgmr.msra.gmra.mrb[0].mxu1 %vm430_vm0, %v1730_v7  ;;  %1651 = vmatprep.mubr.msk.bf16.mxu0 %vm430_vm0, %v1731_v8  ;;  %v1734_v11 = vld [vmem:[%s1836_s14 + $0x18] sm:$0xff]   ;;  %v1736_v13 = vld [vmem:[%s1836_s14 + $0x20] sm:$0xff]   ;;  %v1738_v15 = vld [vmem:[%s1836_s14 + $0x28] sm:$0xff]  }
  0x14   : > { %1687 = vmatprep.mubr.msk.bf16.mxu1 %vm430_vm0, %v1732_v9  ;;  %v1739_v16 = vld [vmem:[%s1831_s11 + $0x30] sm:$0xff]   ;;  %v1741_v18 = vld [vmem:[%s1831_s11 + $0x38] sm:$0xff]   ;;  %v1743_v20 = vld [vmem:[%s1831_s11 + $0x40] sm:$0xff]  }
  0x15   : > { %v1740_v17 = vld [vmem:[%s1836_s14 + $0x30] sm:$0xff]   ;;  %v1742_v19 = vld [vmem:[%s1836_s14 + $0x38] sm:$0xff]   ;;  %v1744_v21 = vld [vmem:[%s1836_s14 + $0x40] sm:$0xff]  }
  0x16   : > { %v1745_v22 = vld [vmem:[%s1831_s11 + $0x48] sm:$0xff]   ;;  %v1747_v24 = vld [vmem:[%s1831_s11 + $0x50] sm:$0xff]   ;;  %v1749_v26 = vld [vmem:[%s1831_s11 + $0x58] sm:$0xff]  }
  0x17   : > { %v1746_v23 = vld [vmem:[%s1836_s14 + $0x48] sm:$0xff]   ;;  %v1748_v25 = vld [vmem:[%s1836_s14 + $0x50] sm:$0xff]   ;;  %v1750_v27 = vld [vmem:[%s1836_s14 + $0x58] sm:$0xff]  }
  0x18   : > { %v1751_v28 = vld [vmem:[%s1831_s11 + $0x60] sm:$0xff]   ;;  %v1753_v30 = vld [vmem:[%s1831_s11 + $0x68] sm:$0xff]   ;;  %v1755_v32 = vld [vmem:[%s1831_s11 + $0x70] sm:$0xff]  }
  0x19   : > { %v1752_v29 = vld [vmem:[%s1836_s14 + $0x60] sm:$0xff]   ;;  %v1754_v31 = vld [vmem:[%s1836_s14 + $0x68] sm:$0xff]   ;;  %v1756_v33 = vld [vmem:[%s1836_s14 + $0x70] sm:$0xff]  }
  0x1a   : > { %1652 = vmatmul.mubr.msk.bf16.gmra.mrb[4].mxu0 %vm430_vm0, %v1733_v10  ;;  %v1757_v34 = vld [vmem:[%s1831_s11 + $0x78] sm:$0xff]  }
  0x1b   : > { %1688 = vmatmul.mubr.msk.bf16.gmra.mrb[4].mxu1 %vm430_vm0, %v1734_v11  ;;  %1655 = vmatprep.mubr.msk.bf16.mxu0 %vm430_vm0, %v1735_v12  ;;  %v1758_v35 = vld [vmem:[%s1836_s14 + $0x78] sm:$0xff]  }
  0x1c   : > { %1691 = vmatprep.mubr.msk.bf16.mxu1 %vm430_vm0, %v1736_v13 }
  0x22   : > { %1656 = vmatmul.mubr.msk.bf16.gmra.mrb[8].mxu0 %vm430_vm0, %v1737_v14 }
  0x23   : > { %1692 = vmatmul.mubr.msk.bf16.gmra.mrb[8].mxu1 %vm430_vm0, %v1738_v15  ;;  %1659 = vmatprep.mubr.msk.bf16.mxu0 %vm430_vm0, %v1739_v16 }
  0x24   : > { %1695 = vmatprep.mubr.msk.bf16.mxu1 %vm430_vm0, %v1740_v17 }
  0x2a   : > { %1660 = vmatmul.mubr.msk.bf16.gmra.mrb[12].mxu0 %vm430_vm0, %v1741_v18 }
  0x2b   : > { %1696 = vmatmul.mubr.msk.bf16.gmra.mrb[12].mxu1 %vm430_vm0, %v1742_v19  ;;  %1663 = vmatprep.mubr.msk.bf16.mxu0 %vm430_vm0, %v1743_v20 }
  0x2c   : > { %1699 = vmatprep.mubr.msk.bf16.mxu1 %vm430_vm0, %v1744_v21 }
  0x32   : > { %1664 = vmatmul.mubr.msk.bf16.gmra.mrb[16].mxu0 %vm430_vm0, %v1745_v22 }
  0x33   : > { %1700 = vmatmul.mubr.msk.bf16.gmra.mrb[16].mxu1 %vm430_vm0, %v1746_v23  ;;  %1667 = vmatprep.mubr.msk.bf16.mxu0 %vm430_vm0, %v1747_v24 }
  0x34   : > { %1703 = vmatprep.mubr.msk.bf16.mxu1 %vm430_vm0, %v1748_v25 }
  0x3a   : > { %1668 = vmatmul.mubr.msk.bf16.gmra.mrb[20].mxu0 %vm430_vm0, %v1749_v26 }
  0x3b   : > { %1704 = vmatmul.mubr.msk.bf16.gmra.mrb[20].mxu1 %vm430_vm0, %v1750_v27  ;;  %1671 = vmatprep.mubr.msk.bf16.mxu0 %vm430_vm0, %v1751_v28 }
  0x3c   : > { %1707 = vmatprep.mubr.msk.bf16.mxu1 %vm430_vm0, %v1752_v29 }
  0x42   : > { %1672 = vmatmul.mubr.msk.bf16.gmra.mrb[24].mxu0 %vm430_vm0, %v1753_v30 }
  0x43   : > { %1708 = vmatmul.mubr.msk.bf16.gmra.mrb[24].mxu1 %vm430_vm0, %v1754_v31  ;;  %1675 = vmatprep.mubr.msk.bf16.mxu0 %vm430_vm0, %v1755_v32 }
  0x44   : > { %1711 = vmatprep.mubr.msk.bf16.mxu1 %vm430_vm0, %v1756_v33 }
  0x4a   : > { %1676 = vmatmul.mubr.msk.bf16.gmra.mrb[28].mxu0 %vm430_vm0, %v1757_v34 }
  0x4b   : > { %1712 = vmatmul.mubr.msk.bf16.gmra.mrb[28].mxu1 %vm430_vm0, %v1758_v35 }
  0xe5   : > { %v1649_v36 = vpop.f32.mrb[0].mxu0 }
  0xe6   : > { %980 = vst.msk [vmem:[%s1906_s18 + $0x10] sm:$0xff] %vm977_vm1, %v1649_v36  ;;  %v1685_v37 = vpop.f32.mrb[0].mxu1  ;;  %v513_v38 = vpop.f32.mrb[1].mxu0  ;;  %v1045_v41 = vsel %vm977_vm1, %v1649_v36, 0.0  ;;  %v1113_v46 = vmul.f32 %v1649_v36, %v1649_v36 }
  0xe7   : > { %1012 = vst.msk [vmem:[%s1911_s23 + $0x10] sm:$0xff] %vm977_vm1, %v1685_v37  ;;  %978 = vst.msk [vmem:[%s1906_s18] sm:$0xff] %vm977_vm1, %v513_v38  ;;  %v850_v39 = vpop.f32.mrb[1].mxu1  ;;  %v1650_v40 = vpop.f32.mrb[2].mxu0  ;;  %v1111_v42 = vmul.f32 %v513_v38, %v513_v38  ;;  %v1215_v47 = vsel %vm977_vm1, %v1685_v37, 0.0  ;;  %v1283_v48 = vmul.f32 %v1685_v37, %v1685_v37  ;;  %v1042_v51 = vsel %vm977_vm1, %v513_v38, 0.0 }
  0xe8   : > { %1010 = vst.msk [vmem:[%s1911_s23] sm:$0xff] %vm977_vm1, %v850_v39  ;;  %v1281_v43 = vmul.f32 %v850_v39, %v850_v39  ;;  %981 = vst.msk [vmem:[%s1906_s18 + $0x18] sm:$0xff] %vm977_vm1, %v1650_v40  ;;  %v1686_v44 = vpop.f32.mrb[2].mxu1  ;;  %v516_v45 = vpop.f32.mrb[3].mxu0  ;;  %v1212_v49 = vsel %vm977_vm1, %v850_v39, 0.0  ;;  %v1114_v52 = vmul.f32 %v1650_v40, %v1650_v40  ;;  %v1146_v63 = vsel %vm977_vm1, %v1113_v46, 0.0 }
  0xe9   : > { %1013 = vst.msk [vmem:[%s1911_s23 + $0x18] sm:$0xff] %vm977_vm1, %v1686_v44  ;;  %979 = vst.msk [vmem:[%s1906_s18 + $0x8] sm:$0xff] %vm977_vm1, %v516_v45  ;;  %v853_v50 = vpop.f32.mrb[3].mxu1  ;;  %v1043_v53 = vsel %vm977_vm1, %v516_v45, 0.0  ;;  %v1112_v54 = vmul.f32 %v516_v45, %v516_v45  ;;  %v1143_v59 = vsel %vm977_vm1, %v1111_v42, 0.0  ;;  %v1284_v60 = vmul.f32 %v1686_v44, %v1686_v44 }
  0xea   : > { %1011 = vst.msk [vmem:[%s1911_s23 + $0x8] sm:$0xff] %vm977_vm1, %v853_v50  ;;  %v1313_v55 = vsel %vm977_vm1, %v1281_v43, 0.0  ;;  %v1044_v56 = vadd.f32 %v1043_v53, %v1042_v51  ;;  %v1213_v57 = vsel %vm977_vm1, %v853_v50, 0.0  ;;  %v1282_v58 = vmul.f32 %v853_v50, %v853_v50 }
  0xeb   : > { %v1144_v61 = vsel %vm977_vm1, %v1112_v54, 0.0  ;;  %v1214_v62 = vadd.f32 %v1213_v57, %v1212_v49  ;;  %v1316_v4 = vsel %vm977_vm1, %v1283_v48, 0.0  ;;  %v1047_v5 = vsel %vm977_vm1, %v1650_v40, 0.0 }
  0xec   : > { %v1046_v0 = vadd.f32 %v1045_v41, %v1044_v56  ;;  %v1145_v1 = vadd.f32 %v1144_v61, %v1143_v59  ;;  %v1314_v2 = vsel %vm977_vm1, %v1282_v58, 0.0  ;;  %v1148_v10 = vsel %vm977_vm1, %v1114_v52, 0.0 }
  0xed   : > { %v1653_v3 = vpop.f32.mrb[4].mxu0  ;;  %v1216_v6 = vadd.f32 %v1215_v47, %v1214_v62  ;;  %v1315_v7 = vadd.f32 %v1314_v2, %v1313_v55  ;;  %v1217_v11 = vsel %vm977_vm1, %v1686_v44, 0.0  ;;  %v1318_v16 = vsel %vm977_vm1, %v1284_v60, 0.0 }
  0xee   : > { %984 = vst.msk [vmem:[%s1906_s18 + $0x30] sm:$0xff] %vm977_vm1, %v1653_v3  ;;  %v1689_v8 = vpop.f32.mrb[4].mxu1  ;;  %v529_v9 = vpop.f32.mrb[5].mxu0  ;;  %v1147_v12 = vadd.f32 %v1146_v63, %v1145_v1  ;;  %v1048_v13 = vadd.f32 %v1047_v5, %v1046_v0  ;;  %v1117_v22 = vmul.f32 %v1653_v3, %v1653_v3  ;;  %v1053_v34 = vsel %vm977_vm1, %v1653_v3, 0.0 }
  0xef   : > { %1016 = vst.msk [vmem:[%s1911_s23 + $0x30] sm:$0xff] %vm977_vm1, %v1689_v8  ;;  %982 = vst.msk [vmem:[%s1906_s18 + $0x20] sm:$0xff] %vm977_vm1, %v529_v9  ;;  %v866_v14 = vpop.f32.mrb[5].mxu1  ;;  %v1654_v15 = vpop.f32.mrb[6].mxu0  ;;  %v1317_v17 = vadd.f32 %v1316_v4, %v1315_v7  ;;  %v1049_v18 = vsel %vm977_vm1, %v529_v9, 0.0  ;;  %v1115_v19 = vmul.f32 %v529_v9, %v529_v9  ;;  %v1218_v25 = vadd.f32 %v1217_v11, %v1216_v6 }
  0xf0   : > { %1014 = vst.msk [vmem:[%s1911_s23 + $0x20] sm:$0xff] %vm977_vm1, %v866_v14  ;;  %985 = vst.msk [vmem:[%s1906_s18 + $0x38] sm:$0xff] %vm977_vm1, %v1654_v15  ;;  %v1690_v20 = vpop.f32.mrb[6].mxu1  ;;  %v532_v21 = vpop.f32.mrb[7].mxu0  ;;  %v1050_v23 = vadd.f32 %v1049_v18, %v1048_v13  ;;  %v1149_v24 = vadd.f32 %v1148_v10, %v1147_v12  ;;  %v1219_v28 = vsel %vm977_vm1, %v866_v14, 0.0  ;;  %v1285_v29 = vmul.f32 %v866_v14, %v866_v14 }
  0xf1   : > { %1017 = vst.msk [vmem:[%s1911_s23 + $0x38] sm:$0xff] %vm977_vm1, %v1690_v20  ;;  %983 = vst.msk [vmem:[%s1906_s18 + $0x28] sm:$0xff] %vm977_vm1, %v532_v21  ;;  %v869_v26 = vpop.f32.mrb[7].mxu1  ;;  %v1150_v27 = vsel %vm977_vm1, %v1115_v19, 0.0  ;;  %v1319_v30 = vadd.f32 %v1318_v16, %v1317_v17  ;;  %v1287_v31 = vmul.f32 %v1689_v8, %v1689_v8  ;;  %v1220_v33 = vadd.f32 %v1219_v28, %v1218_v25 }
  0xf2   : > { %1015 = vst.msk [vmem:[%s1911_s23 + $0x28] sm:$0xff] %vm977_vm1, %v869_v26  ;;  %v1151_v32 = vadd.f32 %v1150_v27, %v1149_v24  ;;  %v1223_v35 = vsel %vm977_vm1, %v1689_v8, 0.0  ;;  %v1320_v36 = vsel %vm977_vm1, %v1285_v29, 0.0  ;;  %v1051_v37 = vsel %vm977_vm1, %v532_v21, 0.0 }
  0xf3   : > { %v1321_v38 = vadd.f32 %v1320_v36, %v1319_v30  ;;  %v1118_v39 = vmul.f32 %v1654_v15, %v1654_v15  ;;  %v1052_v40 = vadd.f32 %v1051_v37, %v1050_v23  ;;  %v1116_v41 = vmul.f32 %v532_v21, %v532_v21 }
  0xf4   : > { %v1154_v43 = vsel %vm977_vm1, %v1117_v22, 0.0  ;;  %v1288_v44 = vmul.f32 %v1690_v20, %v1690_v20  ;;  %v1221_v45 = vsel %vm977_vm1, %v869_v26, 0.0  ;;  %v1286_v46 = vmul.f32 %v869_v26, %v869_v26 }
  0xf5   : > { %v1657_v42 = vpop.f32.mrb[8].mxu0  ;;  %v1324_v49 = vsel %vm977_vm1, %v1287_v31, 0.0  ;;  %v1054_v50 = vadd.f32 %v1053_v34, %v1052_v40  ;;  %v1152_v51 = vsel %vm977_vm1, %v1116_v41, 0.0  ;;  %v1222_v52 = vadd.f32 %v1221_v45, %v1220_v33 }
  0xf6   : > { %988 = vst.msk [vmem:[%s1906_s18 + $0x50] sm:$0xff] %vm977_vm1, %v1657_v42  ;;  %v1693_v47 = vpop.f32.mrb[8].mxu1  ;;  %v545_v48 = vpop.f32.mrb[9].mxu0  ;;  %v1055_v55 = vsel %vm977_vm1, %v1654_v15, 0.0  ;;  %v1225_v56 = vsel %vm977_vm1, %v1690_v20, 0.0  ;;  %v1153_v57 = vadd.f32 %v1152_v51, %v1151_v32  ;;  %v1322_v58 = vsel %vm977_vm1, %v1286_v46, 0.0 }
  0xf7   : > { %1020 = vst.msk [vmem:[%s1911_s23 + $0x50] sm:$0xff] %vm977_vm1, %v1693_v47  ;;  %986 = vst.msk [vmem:[%s1906_s18 + $0x40] sm:$0xff] %vm977_vm1, %v545_v48  ;;  %v882_v53 = vpop.f32.mrb[9].mxu1  ;;  %v1978_v54 = vpop.f32.mrb[10].mxu0  ;;  %v1156_v61 = vsel %vm977_vm1, %v1118_v39, 0.0  ;;  %v1224_v62 = vadd.f32 %v1223_v35, %v1222_v52  ;;  %v1323_v63 = vadd.f32 %v1322_v58, %v1321_v38  ;;  %v1056_v0 = vadd.f32 %v1055_v55, %v1054_v50 }
  0xf8   : > { %1018 = vst.msk [vmem:[%s1911_s23 + $0x40] sm:$0xff] %vm977_vm1, %v882_v53  ;;  %989 = vst.msk [vmem:[%s1906_s18 + $0x58] sm:$0xff] %vm977_vm1, %v1978_v54  ;;  %v1694_v59 = vpop.f32.mrb[10].mxu1  ;;  %v548_v60 = vpop.f32.mrb[11].mxu0  ;;  %v1326_v2 = vsel %vm977_vm1, %v1288_v44, 0.0  ;;  %v1155_v3 = vadd.f32 %v1154_v43, %v1153_v57  ;;  %v1057_v4 = vsel %vm977_vm1, %v545_v48, 0.0  ;;  %v1119_v5 = vmul.f32 %v545_v48, %v545_v48 }
  0xf9   : > { %1021 = vst.msk [vmem:[%s1911_s23 + $0x58] sm:$0xff] %vm977_vm1, %v1694_v59  ;;  %987 = vst.msk [vmem:[%s1906_s18 + $0x48] sm:$0xff] %vm977_vm1, %v548_v60  ;;  %v885_v1 = vpop.f32.mrb[11].mxu1  ;;  %v1325_v6 = vadd.f32 %v1324_v49, %v1323_v63  ;;  %v1058_v7 = vadd.f32 %v1057_v4, %v1056_v0  ;;  %v1226_v8 = vadd.f32 %v1225_v56, %v1224_v62  ;;  %v1227_v9 = vsel %vm977_vm1, %v882_v53, 0.0 }
  0xfa   : > { %1019 = vst.msk [vmem:[%s1911_s23 + $0x48] sm:$0xff] %vm977_vm1, %v885_v1  ;;  %v1121_v10 = vmul.f32 %v1657_v42, %v1657_v42  ;;  %v1157_v11 = vadd.f32 %v1156_v61, %v1155_v3  ;;  %v1158_v12 = vsel %vm977_vm1, %v1119_v5, 0.0  ;;  %v1289_v13 = vmul.f32 %v882_v53, %v882_v53 }
  0xfb   : > { %v1061_v14 = vsel %vm977_vm1, %v1657_v42, 0.0  ;;  %v1291_v15 = vmul.f32 %v1693_v47, %v1693_v47  ;;  %v1228_v16 = vadd.f32 %v1227_v9, %v1226_v8  ;;  %v1327_v17 = vadd.f32 %v1326_v2, %v1325_v6 }
  0xfc   : > { %v1231_v19 = vsel %vm977_vm1, %v1693_v47, 0.0  ;;  %v1159_v20 = vadd.f32 %v1158_v12, %v1157_v11  ;;  %v1328_v21 = vsel %vm977_vm1, %v1289_v13, 0.0  ;;  %v1059_v22 = vsel %vm977_vm1, %v548_v60, 0.0 }
  0xfd   : > { %v1661_v18 = vpop.f32.mrb[12].mxu0  ;;  %v1329_v25 = vadd.f32 %v1328_v21, %v1327_v17  ;;  %v1122_v26 = vmul.f32 %v1978_v54, %v1978_v54  ;;  %v1060_v27 = vadd.f32 %v1059_v22, %v1058_v7  ;;  %v1120_v28 = vmul.f32 %v548_v60, %v548_v60 }
  0xfe   : > { %992 = vst.msk [vmem:[%s1906_s18 + $0x70] sm:$0xff] %vm977_vm1, %v1661_v18  ;;  %v1697_v23 = vpop.f32.mrb[12].mxu1  ;;  %v561_v24 = vpop.f32.mrb[13].mxu0  ;;  %v1162_v31 = vsel %vm977_vm1, %v1121_v10, 0.0  ;;  %v1292_v32 = vmul.f32 %v1694_v59, %v1694_v59  ;;  %v1229_v33 = vsel %vm977_vm1, %v885_v1, 0.0  ;;  %v1290_v34 = vmul.f32 %v885_v1, %v885_v1 }
  0xff   : > { %1024 = vst.msk [vmem:[%s1911_s23 + $0x70] sm:$0xff] %vm977_vm1, %v1697_v23  ;;  %990 = vst.msk [vmem:[%s1906_s18 + $0x60] sm:$0xff] %vm977_vm1, %v561_v24  ;;  %v898_v29 = vpop.f32.mrb[13].mxu1  ;;  %v2011_v30 = vpop.f32.mrb[14].mxu0  ;;  %v1332_v37 = vsel %vm977_vm1, %v1291_v15, 0.0  ;;  %v1062_v38 = vadd.f32 %v1061_v14, %v1060_v27  ;;  %v1160_v39 = vsel %vm977_vm1, %v1120_v28, 0.0  ;;  %v1230_v40 = vadd.f32 %v1229_v33, %v1228_v16 }
 0x100   : > { %1022 = vst.msk [vmem:[%s1911_s23 + $0x60] sm:$0xff] %vm977_vm1, %v898_v29  ;;  %993 = vst.msk [vmem:[%s1906_s18 + $0x78] sm:$0xff] %vm977_vm1, %v2011_v30  ;;  %v2020_v35 = vpop.f32.mrb[14].mxu1  ;;  %v564_v36 = vpop.f32.mrb[15].mxu0  ;;  %v1063_v42 = vsel %vm977_vm1, %v1978_v54, 0.0  ;;  %v1233_v43 = vsel %vm977_vm1, %v1694_v59, 0.0  ;;  %v1161_v44 = vadd.f32 %v1160_v39, %v1159_v20  ;;  %v1123_v53 = vmul.f32 %v561_v24, %v561_v24 }
 0x101   : > { %1025 = vst.msk [vmem:[%s1911_s23 + $0x78] sm:$0xff] %vm977_vm1, %v2020_v35  ;;  %991 = vst.msk [vmem:[%s1906_s18 + $0x68] sm:$0xff] %vm977_vm1, %v564_v36  ;;  %v901_v41 = vpop.f32.mrb[15].mxu1  ;;  %v1330_v45 = vsel %vm977_vm1, %v1290_v34, 0.0  ;;  %v1164_v46 = vsel %vm977_vm1, %v1122_v26, 0.0  ;;  %v1232_v47 = vadd.f32 %v1231_v19, %v1230_v40  ;;  %v1064_v49 = vadd.f32 %v1063_v42, %v1062_v38 }
 0x102   : > { %1023 = vst.msk [vmem:[%s1911_s23 + $0x68] sm:$0xff] %vm977_vm1, %v901_v41  ;;  %v1331_v48 = vadd.f32 %v1330_v45, %v1329_v25  ;;  %v1334_v50 = vsel %vm977_vm1, %v1292_v32, 0.0  ;;  %v1163_v51 = vadd.f32 %v1162_v31, %v1161_v44  ;;  %v1065_v52 = vsel %vm977_vm1, %v561_v24, 0.0 }
 0x103   : > { %v1066_v55 = vadd.f32 %v1065_v52, %v1064_v49  ;;  %v1234_v56 = vadd.f32 %v1233_v43, %v1232_v47  ;;  %v1235_v57 = vsel %vm977_vm1, %v898_v29, 0.0  ;;  %v1125_v59 = vmul.f32 %v1661_v18, %v1661_v18 }
 0x104   : > { %v1333_v54 = vadd.f32 %v1332_v37, %v1331_v48  ;;  %v1165_v60 = vadd.f32 %v1164_v46, %v1163_v51  ;;  %v1166_v61 = vsel %vm977_vm1, %v1123_v53, 0.0  ;;  %v1293_v62 = vmul.f32 %v898_v29, %v898_v29 }
 0x105   : > { %v2039_v58 = vpop.f32.mrb[16].mxu0  ;;  %v1069_v1 = vsel %vm977_vm1, %v1661_v18, 0.0  ;;  %v1295_v2 = vmul.f32 %v1697_v23, %v1697_v23  ;;  %v1236_v3 = vadd.f32 %v1235_v57, %v1234_v56  ;;  %v1239_v7 = vsel %vm977_vm1, %v1697_v23, 0.0 }
 0x106   : > { %996 = vst.msk [vmem:[%s1906_s18 + $0x90] sm:$0xff] %vm977_vm1, %v2039_v58  ;;  %v2045_v63 = vpop.f32.mrb[16].mxu1  ;;  %v577_v0 = vpop.f32.mrb[17].mxu0  ;;  %v1335_v4 = vadd.f32 %v1334_v50, %v1333_v54  ;;  %v1167_v8 = vadd.f32 %v1166_v61, %v1165_v60  ;;  %v1336_v9 = vsel %vm977_vm1, %v1293_v62, 0.0  ;;  %v1067_v10 = vsel %vm977_vm1, %v564_v36, 0.0 }
 0x107   : > { %1028 = vst.msk [vmem:[%s1911_s23 + $0x90] sm:$0xff] %vm977_vm1, %v2045_v63  ;;  %994 = vst.msk [vmem:[%s1906_s18 + $0x80] sm:$0xff] %vm977_vm1, %v577_v0  ;;  %v914_v5 = vpop.f32.mrb[17].mxu1  ;;  %v2053_v6 = vpop.f32.mrb[18].mxu0  ;;  %v1126_v14 = vmul.f32 %v2011_v30, %v2011_v30  ;;  %v1068_v15 = vadd.f32 %v1067_v10, %v1066_v55  ;;  %v1124_v16 = vmul.f32 %v564_v36, %v564_v36  ;;  %v1170_v18 = vsel %vm977_vm1, %v1125_v59, 0.0 }
 0x108   : > { %1026 = vst.msk [vmem:[%s1911_s23 + $0x80] sm:$0xff] %vm977_vm1, %v914_v5  ;;  %997 = vst.msk [vmem:[%s1906_s18 + $0x98] sm:$0xff] %vm977_vm1, %v2053_v6  ;;  %v2063_v11 = vpop.f32.mrb[18].mxu1  ;;  %v2065_v12 = vpop.f32.mrb[19].mxu0  ;;  %v1337_v13 = vadd.f32 %v1336_v9, %v1335_v4  ;;  %v1296_v19 = vmul.f32 %v2020_v35, %v2020_v35  ;;  %v1237_v20 = vsel %vm977_vm1, %v901_v41, 0.0  ;;  %v1294_v21 = vmul.f32 %v901_v41, %v901_v41 }
 0x109   : > { %1029 = vst.msk [vmem:[%s1911_s23 + $0x98] sm:$0xff] %vm977_vm1, %v2063_v11  ;;  %995 = vst.msk [vmem:[%s1906_s18 + $0x88] sm:$0xff] %vm977_vm1, %v2065_v12  ;;  %v917_v17 = vpop.f32.mrb[19].mxu1  ;;  %v1340_v22 = vsel %vm977_vm1, %v1295_v2, 0.0  ;;  %v1070_v23 = vadd.f32 %v1069_v1, %v1068_v15  ;;  %v1168_v24 = vsel %vm977_vm1, %v1124_v16, 0.0  ;;  %v1238_v25 = vadd.f32 %v1237_v20, %v1236_v3 }
 0x10a   : > { %1027 = vst.msk [vmem:[%s1911_s23 + $0x88] sm:$0xff] %vm977_vm1, %v917_v17  ;;  %v1071_v26 = vsel %vm977_vm1, %v2011_v30, 0.0  ;;  %v1241_v27 = vsel %vm977_vm1, %v2020_v35, 0.0  ;;  %v1169_v28 = vadd.f32 %v1168_v24, %v1167_v8  ;;  %v1338_v29 = vsel %vm977_vm1, %v1294_v21, 0.0 }
 0x10b   : > { %v1172_v31 = vsel %vm977_vm1, %v1126_v14, 0.0  ;;  %v1240_v32 = vadd.f32 %v1239_v7, %v1238_v25  ;;  %v1339_v33 = vadd.f32 %v1338_v29, %v1337_v13  ;;  %v1072_v34 = vadd.f32 %v1071_v26, %v1070_v23 }
 0x10c   : > { %v1342_v37 = vsel %vm977_vm1, %v1296_v19, 0.0  ;;  %v1171_v38 = vadd.f32 %v1170_v18, %v1169_v28  ;;  %v1073_v30 = vsel %vm977_vm1, %v577_v0, 0.0  ;;  %v1127_v39 = vmul.f32 %v577_v0, %v577_v0 }
 0x10d   : > { %v2089_v36 = vpop.f32.mrb[20].mxu0  ;;  %v1341_v41 = vadd.f32 %v1340_v22, %v1339_v33  ;;  %v1074_v42 = vadd.f32 %v1073_v30, %v1072_v34  ;;  %v1242_v43 = vadd.f32 %v1241_v27, %v1240_v32  ;;  %v1243_v44 = vsel %vm977_vm1, %v914_v5, 0.0 }
 0x10e   : > { %1000 = vst.msk [vmem:[%s1906_s18 + $0xb0] sm:$0xff] %vm977_vm1, %v2089_v36  ;;  %v2096_v35 = vpop.f32.mrb[20].mxu1  ;;  %v593_v40 = vpop.f32.mrb[21].mxu0  ;;  %v1129_v47 = vmul.f32 %v2039_v58, %v2039_v58  ;;  %v1173_v48 = vadd.f32 %v1172_v31, %v1171_v38  ;;  %v1174_v49 = vsel %vm977_vm1, %v1127_v39, 0.0  ;;  %v1297_v50 = vmul.f32 %v914_v5, %v914_v5 }
 0x10f   : > { %1032 = vst.msk [vmem:[%s1911_s23 + $0xb0] sm:$0xff] %vm977_vm1, %v2096_v35  ;;  %998 = vst.msk [vmem:[%s1906_s18 + $0xa0] sm:$0xff] %vm977_vm1, %v593_v40  ;;  %v2104_v45 = vpop.f32.mrb[21].mxu1  ;;  %v2106_v46 = vpop.f32.mrb[22].mxu0  ;;  %v1077_v53 = vsel %vm977_vm1, %v2039_v58, 0.0  ;;  %v1299_v54 = vmul.f32 %v2045_v63, %v2045_v63  ;;  %v1244_v55 = vadd.f32 %v1243_v44, %v1242_v43  ;;  %v1343_v56 = vadd.f32 %v1342_v37, %v1341_v41 }
 0x110   : > { %1030 = vst.msk [vmem:[%s1911_s23 + $0xa0] sm:$0xff] %vm977_vm1, %v2104_v45  ;;  %1001 = vst.msk [vmem:[%s1906_s18 + $0xb8] sm:$0xff] %vm977_vm1, %v2106_v46  ;;  %v2117_v51 = vpop.f32.mrb[22].mxu1  ;;  %v2119_v52 = vpop.f32.mrb[23].mxu0  ;;  %v1247_v59 = vsel %vm977_vm1, %v2045_v63, 0.0  ;;  %v1175_v60 = vadd.f32 %v1174_v49, %v1173_v48  ;;  %v1344_v61 = vsel %vm977_vm1, %v1297_v50, 0.0  ;;  %v1130_v0 = vmul.f32 %v2053_v6, %v2053_v6 }
 0x111   : > { %1033 = vst.msk [vmem:[%s1911_s23 + $0xb8] sm:$0xff] %vm977_vm1, %v2117_v51  ;;  %999 = vst.msk [vmem:[%s1906_s18 + $0xa8] sm:$0xff] %vm977_vm1, %v2119_v52  ;;  %v2131_v57 = vpop.f32.mrb[23].mxu1  ;;  %v1075_v58 = vsel %vm977_vm1, %v2065_v12, 0.0  ;;  %v1345_v62 = vadd.f32 %v1344_v61, %v1343_v56  ;;  %v1128_v2 = vmul.f32 %v2065_v12, %v2065_v12  ;;  %v1178_v63 = vsel %vm977_vm1, %v1129_v47, 0.0 }
 0x112   : > { %1031 = vst.msk [vmem:[%s1911_s23 + $0xa8] sm:$0xff] %vm977_vm1, %v2131_v57  ;;  %v1076_v1 = vadd.f32 %v1075_v58, %v1074_v42  ;;  %v1300_v3 = vmul.f32 %v2063_v11, %v2063_v11  ;;  %v1245_v4 = vsel %vm977_vm1, %v917_v17, 0.0  ;;  %v1298_v5 = vmul.f32 %v917_v17, %v917_v17 }
 0x113   : > { %v1348_v7 = vsel %vm977_vm1, %v1299_v54, 0.0  ;;  %v1176_v9 = vsel %vm977_vm1, %v1128_v2, 0.0  ;;  %v1246_v10 = vadd.f32 %v1245_v4, %v1244_v55  ;;  %v1079_v12 = vsel %vm977_vm1, %v2053_v6, 0.0 }
 0x114   : > { %v1078_v8 = vadd.f32 %v1077_v53, %v1076_v1  ;;  %v1249_v14 = vsel %vm977_vm1, %v2063_v11, 0.0  ;;  %v1177_v15 = vadd.f32 %v1176_v9, %v1175_v60  ;;  %v1346_v16 = vsel %vm977_vm1, %v1298_v5, 0.0 }
 0x115   : > { %v2151_v13 = vpop.f32.mrb[24].mxu0  ;;  %v1180_v19 = vsel %vm977_vm1, %v1130_v0, 0.0  ;;  %v1248_v20 = vadd.f32 %v1247_v59, %v1246_v10  ;;  %v1347_v21 = vadd.f32 %v1346_v16, %v1345_v62  ;;  %v1350_v23 = vsel %vm977_vm1, %v1300_v3, 0.0 }
 0x116   : > { %1004 = vst.msk [vmem:[%s1906_s18 + $0xd0] sm:$0xff] %vm977_vm1, %v2151_v13  ;;  %v2161_v17 = vpop.f32.mrb[24].mxu1  ;;  %v2163_v18 = vpop.f32.mrb[25].mxu0  ;;  %v1080_v6 = vadd.f32 %v1079_v12, %v1078_v8  ;;  %v1179_v24 = vadd.f32 %v1178_v63, %v1177_v15  ;;  %v1081_v25 = vsel %vm977_vm1, %v593_v40, 0.0  ;;  %v1131_v26 = vmul.f32 %v593_v40, %v593_v40 }
 0x117   : > { %1036 = vst.msk [vmem:[%s1911_s23 + $0xd0] sm:$0xff] %vm977_vm1, %v2161_v17  ;;  %1002 = vst.msk [vmem:[%s1906_s18 + $0xc0] sm:$0xff] %vm977_vm1, %v2163_v18  ;;  %v2172_v11 = vpop.f32.mrb[25].mxu1  ;;  %v2174_v22 = vpop.f32.mrb[26].mxu0  ;;  %v1349_v29 = vadd.f32 %v1348_v7, %v1347_v21  ;;  %v1250_v32 = vadd.f32 %v1249_v14, %v1248_v20  ;;  %v1251_v33 = vsel %vm977_vm1, %v2104_v45, 0.0  ;;  %v1133_v37 = vmul.f32 %v2089_v36, %v2089_v36 }
 0x118   : > { %1034 = vst.msk [vmem:[%s1911_s23 + $0xc0] sm:$0xff] %vm977_vm1, %v2172_v11  ;;  %1005 = vst.msk [vmem:[%s1906_s18 + $0xd8] sm:$0xff] %vm977_vm1, %v2174_v22  ;;  %v2184_v27 = vpop.f32.mrb[26].mxu1  ;;  %v2186_v28 = vpop.f32.mrb[27].mxu0  ;;  %v1082_v31 = vadd.f32 %v1081_v25, %v1080_v6  ;;  %v1181_v38 = vadd.f32 %v1180_v19, %v1179_v24  ;;  %v1182_v30 = vsel %vm977_vm1, %v1131_v26, 0.0  ;;  %v1301_v39 = vmul.f32 %v2104_v45, %v2104_v45 }
 0x119   : > { %1037 = vst.msk [vmem:[%s1911_s23 + $0xd8] sm:$0xff] %vm977_vm1, %v2184_v27  ;;  %1003 = vst.msk [vmem:[%s1906_s18 + $0xc8] sm:$0xff] %vm977_vm1, %v2186_v28  ;;  %v2196_v34 = vpop.f32.mrb[27].mxu1  ;;  %v1085_v40 = vsel %vm977_vm1, %v2089_v36, 0.0  ;;  %v1303_v41 = vmul.f32 %v2096_v35, %v2096_v35  ;;  %v1252_v42 = vadd.f32 %v1251_v33, %v1250_v32  ;;  %v1351_v43 = vadd.f32 %v1350_v23, %v1349_v29 }
 0x11a   : > { %1035 = vst.msk [vmem:[%s1911_s23 + $0xc8] sm:$0xff] %vm977_vm1, %v2196_v34  ;;  %v1255_v44 = vsel %vm977_vm1, %v2096_v35, 0.0  ;;  %v1183_v47 = vadd.f32 %v1182_v30, %v1181_v38  ;;  %v1352_v48 = vsel %vm977_vm1, %v1301_v39, 0.0  ;;  %v1083_v45 = vsel %vm977_vm1, %v2119_v52, 0.0 }
 0x11b   : > { %v1353_v49 = vadd.f32 %v1352_v48, %v1351_v43  ;;  %v1134_v36 = vmul.f32 %v2106_v46, %v2106_v46  ;;  %v1084_v50 = vadd.f32 %v1083_v45, %v1082_v31  ;;  %v1132_v53 = vmul.f32 %v2119_v52, %v2119_v52 }
 0x11c   : > { %v1186_v35 = vsel %vm977_vm1, %v1133_v37, 0.0  ;;  %v1304_v55 = vmul.f32 %v2117_v51, %v2117_v51  ;;  %v1253_v56 = vsel %vm977_vm1, %v2131_v57, 0.0  ;;  %v1302_v59 = vmul.f32 %v2131_v57, %v2131_v57 }
 0x11d   : > { %v2219_v54 = vpop.f32.mrb[28].mxu0  ;;  %v1356_v61 = vsel %vm977_vm1, %v1303_v41, 0.0  ;;  %v1086_v58 = vadd.f32 %v1085_v40, %v1084_v50  ;;  %v1184_v62 = vsel %vm977_vm1, %v1132_v53, 0.0  ;;  %v1254_v0 = vadd.f32 %v1253_v56, %v1252_v42 }
 0x11e   : > { %1008 = vst.msk [vmem:[%s1906_s18 + $0xf0] sm:$0xff] %vm977_vm1, %v2219_v54  ;;  %v2231_v60 = vpop.f32.mrb[28].mxu1  ;;  %v2233_v52 = vpop.f32.mrb[29].mxu0  ;;  %v1087_v2 = vsel %vm977_vm1, %v2106_v46, 0.0  ;;  %v1257_v63 = vsel %vm977_vm1, %v2117_v51, 0.0  ;;  %v1185_v3 = vadd.f32 %v1184_v62, %v1183_v47  ;;  %v1354_v4 = vsel %vm977_vm1, %v1302_v59, 0.0 }
 0x11f   : > { %1040 = vst.msk [vmem:[%s1911_s23 + $0xf0] sm:$0xff] %vm977_vm1, %v2231_v60  ;;  %1006 = vst.msk [vmem:[%s1906_s18 + $0xe0] sm:$0xff] %vm977_vm1, %v2233_v52  ;;  %v2243_v57 = vpop.f32.mrb[29].mxu1  ;;  %v2245_v1 = vpop.f32.mrb[30].mxu0  ;;  %v1188_v8 = vsel %vm977_vm1, %v1134_v36, 0.0  ;;  %v1256_v46 = vadd.f32 %v1255_v44, %v1254_v0  ;;  %v1355_v9 = vadd.f32 %v1354_v4, %v1353_v49  ;;  %v1088_v10 = vadd.f32 %v1087_v2, %v1086_v58 }
 0x120   : > { %1038 = vst.msk [vmem:[%s1911_s23 + $0xe0] sm:$0xff] %vm977_vm1, %v2243_v57  ;;  %1009 = vst.msk [vmem:[%s1906_s18 + $0xf8] sm:$0xff] %vm977_vm1, %v2245_v1  ;;  %v2258_v5 = vpop.f32.mrb[30].mxu1  ;;  %v2260_v7 = vpop.f32.mrb[31].mxu0  ;;  %v1358_v12 = vsel %vm977_vm1, %v1304_v55, 0.0  ;;  %v1187_v14 = vadd.f32 %v1186_v35, %v1185_v3  ;;  %v1089_v15 = vsel %vm977_vm1, %v2163_v18, 0.0  ;;  %v1135_v16 = vmul.f32 %v2163_v18, %v2163_v18 }
 0x121   : > { %1041 = vst.msk [vmem:[%s1911_s23 + $0xf8] sm:$0xff] %vm977_vm1, %v2258_v5  ;;  %1007 = vst.msk [vmem:[%s1906_s18 + $0xe8] sm:$0xff] %vm977_vm1, %v2260_v7  ;;  %v2269_v51 = vpop.f32.mrb[31].mxu1  ;;  %v1357_v19 = vadd.f32 %v1356_v61, %v1355_v9  ;;  %v1090_v20 = vadd.f32 %v1089_v15, %v1088_v10  ;;  %v1258_v21 = vadd.f32 %v1257_v63, %v1256_v46  ;;  %v1259_v6 = vsel %vm977_vm1, %v2172_v11, 0.0 }
 0x122   : > { %1039 = vst.msk [vmem:[%s1911_s23 + $0xe8] sm:$0xff] %vm977_vm1, %v2269_v51  ;;  %v1137_v23 = vmul.f32 %v2151_v13, %v2151_v13  ;;  %v1189_v24 = vadd.f32 %v1188_v8, %v1187_v14  ;;  %v1190_v25 = vsel %vm977_vm1, %v1135_v16, 0.0  ;;  %v1305_v26 = vmul.f32 %v2172_v11, %v2172_v11 }
 0x123   : > { %v1307_v18 = vmul.f32 %v2161_v17, %v2161_v17  ;;  %v1260_v29 = vadd.f32 %v1259_v6, %v1258_v21  ;;  %v1359_v31 = vadd.f32 %v1358_v12, %v1357_v19  ;;  %v1093_v32 = vsel %vm977_vm1, %v2151_v13, 0.0 }
 0x124   : > { %v1191_v33 = vadd.f32 %v1190_v25, %v1189_v24  ;;  %v1360_v37 = vsel %vm977_vm1, %v1305_v26, 0.0  ;;  %v1091_v38 = vsel %vm977_vm1, %v2186_v28, 0.0  ;;  %v1263_v30 = vsel %vm977_vm1, %v2161_v17, 0.0 }
 0x125   : > { %v1361_v39 = vadd.f32 %v1360_v37, %v1359_v31  ;;  %v1092_v40 = vadd.f32 %v1091_v38, %v1090_v20  ;;  %v1136_v11 = vmul.f32 %v2186_v28, %v2186_v28  ;;  %v1194_v41 = vsel %vm977_vm1, %v1137_v23, 0.0 }
 0x126   : > { %v1138_v42 = vmul.f32 %v2174_v22, %v2174_v22  ;;  %v1261_v13 = vsel %vm977_vm1, %v2196_v34, 0.0  ;;  %v1306_v43 = vmul.f32 %v2196_v34, %v2196_v34  ;;  %v1364_v44 = vsel %vm977_vm1, %v1307_v18, 0.0 }
 0x127   : > { %v1094_v47 = vadd.f32 %v1093_v32, %v1092_v40  ;;  %v1192_v17 = vsel %vm977_vm1, %v1136_v11, 0.0  ;;  %v1262_v48 = vadd.f32 %v1261_v13, %v1260_v29  ;;  %v1095_v28 = vsel %vm977_vm1, %v2174_v22, 0.0 }
 0x128   : > { %v1308_v45 = vmul.f32 %v2184_v27, %v2184_v27  ;;  %v1193_v49 = vadd.f32 %v1192_v17, %v1191_v33  ;;  %v1362_v36 = vsel %vm977_vm1, %v1306_v43, 0.0  ;;  %v1265_v50 = vsel %vm977_vm1, %v2184_v27, 0.0 }
 0x129   : > { %v1264_v53 = vadd.f32 %v1263_v30, %v1262_v48  ;;  %v1363_v34 = vadd.f32 %v1362_v36, %v1361_v39  ;;  %v1096_v35 = vadd.f32 %v1095_v28, %v1094_v47  ;;  %v1196_v55 = vsel %vm977_vm1, %v1138_v42, 0.0 }
 0x12a   : > { %v1195_v56 = vadd.f32 %v1194_v41, %v1193_v49  ;;  %v1097_v59 = vsel %vm977_vm1, %v2233_v52, 0.0  ;;  %v1139_v22 = vmul.f32 %v2233_v52, %v2233_v52  ;;  %v1267_v0 = vsel %vm977_vm1, %v2243_v57, 0.0 }
 0x12b   : > { %v1365_v61 = vadd.f32 %v1364_v44, %v1363_v34  ;;  %v1098_v58 = vadd.f32 %v1097_v59, %v1096_v35  ;;  %v1266_v62 = vadd.f32 %v1265_v50, %v1264_v53  ;;  %v1366_v27 = vsel %vm977_vm1, %v1308_v45, 0.0 }
 0x12c   : > { %v1197_v2 = vadd.f32 %v1196_v55, %v1195_v56  ;;  %v1198_v63 = vsel %vm977_vm1, %v1139_v22, 0.0  ;;  %v1309_v3 = vmul.f32 %v2243_v57, %v2243_v57  ;;  %v1101_v46 = vsel %vm977_vm1, %v2219_v54, 0.0 }
 0x12d   : > { %v1268_v4 = vadd.f32 %v1267_v0, %v1266_v62  ;;  %v1367_v8 = vadd.f32 %v1366_v27, %v1365_v61  ;;  %v1099_v10 = vsel %vm977_vm1, %v2260_v7, 0.0  ;;  %v1141_v12 = vmul.f32 %v2219_v54, %v2219_v54 }
 0x12e   : > { %v1199_v52 = vadd.f32 %v1198_v63, %v1197_v2  ;;  %v1368_v9 = vsel %vm977_vm1, %v1309_v3, 0.0  ;;  %v1100_v15 = vadd.f32 %v1099_v10, %v1098_v58  ;;  %v1140_v16 = vmul.f32 %v2260_v7, %v2260_v7 }
 0x12f   : > { %v1369_v14 = vadd.f32 %v1368_v9, %v1367_v8  ;;  %v1271_v57 = vsel %vm977_vm1, %v2231_v60, 0.0  ;;  %v1311_v19 = vmul.f32 %v2231_v60, %v2231_v60  ;;  %v1269_v20 = vsel %vm977_vm1, %v2269_v51, 0.0 }
 0x130   : > { %v1310_v21 = vmul.f32 %v2269_v51, %v2269_v51  ;;  %v1142_v54 = vmul.f32 %v2245_v1, %v2245_v1  ;;  %v1102_v6 = vadd.f32 %v1101_v46, %v1100_v15  ;;  %v1200_v23 = vsel %vm977_vm1, %v1140_v16, 0.0 }
 0x131   : > { %v1270_v24 = vadd.f32 %v1269_v20, %v1268_v4  ;;  %v1103_v7 = vsel %vm977_vm1, %v2245_v1, 0.0  ;;  %v1312_v25 = vmul.f32 %v2258_v5, %v2258_v5  ;;  %v1201_v60 = vadd.f32 %v1200_v23, %v1199_v52 }
 0x132   : > { %v1370_v26 = vsel %vm977_vm1, %v1310_v21, 0.0  ;;  %v1202_v18 = vsel %vm977_vm1, %v1141_v12, 0.0  ;;  %v1104_v29 = vadd.f32 %v1103_v7, %v1102_v6  ;;  %v1372_v32 = vsel %vm977_vm1, %v1311_v19, 0.0 }
 0x133   : > { %v1272_v51 = vadd.f32 %v1271_v57, %v1270_v24  ;;  %v1371_v31 = vadd.f32 %v1370_v26, %v1369_v14  ;;  %v1273_v33 = vsel %vm977_vm1, %v2258_v5, 0.0  ;;  %v1203_v37 = vadd.f32 %v1202_v18, %v1201_v60 }
 0x134   : > { %v1204_v1 = vsel %vm977_vm1, %v1142_v54, 0.0  ;;  %v1105_v38 = vrot.slane %v1104_v29, 4  ;;  %v1374_v40 = vsel %vm977_vm1, %v1312_v25, 0.0 }
 0x135   : > { %v1274_v30 = vadd.f32 %v1273_v33, %v1272_v51  ;;  %v1373_v39 = vadd.f32 %v1372_v32, %v1371_v31  ;;  %v1205_v11 = vadd.f32 %v1204_v1, %v1203_v37 }
 0x136   : > { %v1106_v41 = vadd.f32 %v1105_v38, %v1104_v29 }
 0x137   : > { %v1275_v42 = vrot.slane %v1274_v30, 4  ;;  %v1375_v13 = vadd.f32 %v1374_v40, %v1373_v39  ;;  %v1206_v43 = vrot.slane %v1205_v11, 4 }
 0x138   : > { %v1107_v44 = vrot.slane %v1106_v41, 2 }
 0x139   : > { %v1276_v47 = vadd.f32 %v1275_v42, %v1274_v30  ;;  %v1376_v17 = vrot.slane %v1375_v13, 4  ;;  %v1207_v48 = vadd.f32 %v1206_v43, %v1205_v11 }
 0x13a   : > { %v1108_v5 = vadd.f32 %v1107_v44, %v1106_v41 }
 0x13b   : > { %v1277_v28 = vrot.slane %v1276_v47, 2  ;;  %v1377_v45 = vadd.f32 %v1376_v17, %v1375_v13  ;;  %v1208_v49 = vrot.slane %v1207_v48, 2 }
 0x13c   : > { %v1109_v53 = vrot.slane %v1108_v5, 1 }
 0x13d   : > { %v1278_v36 = vadd.f32 %v1277_v28, %v1276_v47  ;;  %v1378_v50 = vrot.slane %v1377_v45, 2  ;;  %v1209_v34 = vadd.f32 %v1208_v49, %v1207_v48 }
 0x13e   : > { %v1110_v22 = vadd.f32 %v1109_v53, %v1108_v5 }
 0x13f   : > { %v1279_v35 = vrot.slane %v1278_v36, 1  ;;  %v1379_v55 = vadd.f32 %v1378_v50, %v1377_v45  ;;  %v1210_v56 = vrot.slane %v1209_v34, 1 }
 0x141   : > { %v1380_v59 = vrot.slane %v1379_v55, 1  ;;  %v1211_v61 = vadd.f32 %v1210_v56, %v1209_v34  ;;  %v1280_v58 = vadd.f32 %v1279_v35, %v1278_v36 }
 0x143   : > { %v1383_v62 = vsel %vm1382_vm2, %v1110_v22, %v1211_v61  ;;  %v1381_v0 = vadd.f32 %v1380_v59, %v1379_v55 }
 0x144   : > { %v1385_v27 = vsel %vm1384_vm3, %v1383_v62, %v1280_v58 }
 0x145   : > { %v1387_v2 = vsel %vm1386_vm4, %v1385_v27, %v1381_v0 }
 0x146   : > { %1389 = vst.msk [vmem:[%s300_s27] sm:$0xf] %vm1388_vm5, %v1387_v2 }
 0x147 PF: > { %s17_s21 = sadd.s32 1, %s1765_s21  }
 0x148   : > { %p14_p5 = scmp.ge.s32.totalorder %s17_s21, 4  }
 0x14a   :  { %16 = sbr.rel (!%p14_p5) target bundleno = 1 (0x1), region = 93 }

</bundles_post_ra>
